<compile_context>
chip_gen: v5e
topology: v5e:2x2
jax: 0.10.0
libtpu: 0.0.40
codegen_flags: <defaults>
</compile_context>

<pallas_src>
import functools

import jax
import jax.numpy as jnp
from jax.experimental import pallas as pl
from jax.experimental.pallas import tpu as pltpu

# Above the 16 MiB (v5e) / 32 MiB (v6e/v7x) scoped defaults, below v7x's 64 MiB physical.
_VMEM_LIMIT_BYTES = 48 * 1024 * 1024


# ----------------------------------------------------------------------------
# Shared LayerNorm epilogue (f32 math)
# ----------------------------------------------------------------------------
def _layernorm(y, gamma, beta, eps):
    mean = jnp.mean(y, axis=-1, keepdims=True)
    var = jnp.mean((y - mean) ** 2, axis=-1, keepdims=True)
    return (y - mean) * jax.lax.rsqrt(var + eps) * gamma + beta


# ----------------------------------------------------------------------------
# Spec / tiling helpers
# ----------------------------------------------------------------------------
def _const_spec(shape):
    """Grid-invariant operand: constant block index, single-buffered (no double buffer)."""
    zeros = (0,) * len(shape)
    return pl.BlockSpec(shape, lambda *_: zeros, pipeline_mode=pl.Buffered(1))


def _choose_seq_tile(S):
    # Prefer MXU-friendly tiles; fall back to the full sequence for awkward S.
    # TODO(synk): pad S to a multiple of 128/256 and mask the tail instead of the
    #             full-sequence fallback; make this generation-aware (128 on v5e).
    for ts in (256, 128):
        if S % ts == 0:
            return ts
    return S


def _choose_ff_tile(F):
    for tf in (512, 256, 128):
        if F % tf == 0:
            return tf
    return F


# ----------------------------------------------------------------------------
# Kernel 1: multi-head self-attention + residual + LayerNorm
#   grid = (B, nq); K/V projected once per batch into bf16 per-head VMEM scratch.
# ----------------------------------------------------------------------------
def _mha_ln_kernel(x_ref, wq_ref, bq_ref, wk_ref, bk_ref, wv_ref, bv_ref,
                   wo_ref, bo_ref, gamma_ref, beta_ref, o_ref,
                   k_scr, v_scr, acc_scr, *, heads, head_dim, tq, eps):
    qi = pl.program_id(1)

    # ---- once per batch (q axis is "arbitrary"): K/V projections into scratch ----
    @pl.when(qi == 0)
    def _():
        x_bf = x_ref[...].astype(jnp.bfloat16)                          # (S, D)
        for h in range(heads):                                          # static unroll
            k = jnp.dot(x_bf, wk_ref[h],
                        preferred_element_type=jnp.float32) + bk_ref[h]  # (S, hd)
            v = jnp.dot(x_bf, wv_ref[h],
                        preferred_element_type=jnp.float32) + bv_ref[h]  # (S, hd)
            k_scr[h] = k.astype(jnp.bfloat16)
            v_scr[h] = v.astype(jnp.bfloat16)

    # ---- per q-tile: residual / Q rows straight off the ref (no full-seq value) ----
    q_start = pl.multiple_of(qi * tq, tq)
    xq = x_ref[pl.ds(q_start, tq), :]                                   # (tq, D) f32
    xq_bf = xq.astype(jnp.bfloat16)

    scale = 1.0 / (head_dim ** 0.5)
    acc_scr[...] = jnp.zeros_like(acc_scr)
    for h in range(heads):                                              # lane-aligned heads
        qh = jnp.dot(xq_bf, wq_ref[h],
                     preferred_element_type=jnp.float32) + bq_ref[h]    # (tq, hd)
        # scores = qh @ k^T without an explicit transpose (contract dim 1 on both).
        s = jax.lax.dot_general(qh.astype(jnp.bfloat16), k_scr[h],
                                (((1,), (1,)), ((), ())),
                                preferred_element_type=jnp.float32) * scale   # (tq, S)
        m = jnp.max(s, axis=-1, keepdims=True)
        e = jnp.exp(s - m)                                              # f32 EUP (v5e-safe)
        p = e * pl.reciprocal(jnp.sum(e, axis=-1, keepdims=True), approx=True)
        ctx = jnp.dot(p.astype(jnp.bfloat16), v_scr[h],
                      preferred_element_type=jnp.float32)               # (tq, hd)
        # Accumulate this head directly into the output projection (no concat).
        acc_scr[...] += jnp.dot(ctx.astype(jnp.bfloat16), wo_ref[h],
                                preferred_element_type=jnp.float32)     # (tq, D)

    y = acc_scr[...] + bo_ref[...] + xq                                 # attn + residual (f32)
    o_ref[...] = _layernorm(y, gamma_ref[...], beta_ref[...], eps).astype(o_ref.dtype)


# ----------------------------------------------------------------------------
# Kernel 2: point-wise FFN + residual + LayerNorm, hidden dim F tiled on grid axis 2
# ----------------------------------------------------------------------------
def _ffn_ln_kernel(x_ref, w1_ref, b1_ref, w2_ref, b2_ref, gamma_ref, beta_ref,
                   o_ref, acc_ref, *, eps):
    fi = pl.program_id(2)

    @pl.when(fi == 0)
    def _():
        acc_ref[...] = jnp.zeros_like(acc_ref)

    x = x_ref[...]                                                      # (ts, D) f32
    h = jnp.dot(x.astype(jnp.bfloat16), w1_ref[...],
                preferred_element_type=jnp.float32) + b1_ref[...]       # (ts, tf)
    h = jnp.maximum(h, 0.0)                                             # ReLU
    acc_ref[...] += jnp.dot(h.astype(jnp.bfloat16), w2_ref[...],
                            preferred_element_type=jnp.float32)         # (ts, D)

    @pl.when(fi == pl.num_programs(2) - 1)
    def _():
        y = acc_ref[...] + b2_ref[...] + x                              # FFN + residual (f32)
        o_ref[...] = _layernorm(y, gamma_ref[...], beta_ref[...], eps).astype(o_ref.dtype)


# ----------------------------------------------------------------------------
# Wrappers
# ----------------------------------------------------------------------------
def mha_add_layernorm(x, p):
    B, S, D = x.shape
    heads = p["heads"]
    hd = D // heads
    tq = _choose_seq_tile(S)
    nq = S // tq

    # Host-side per-head layouts so in-kernel head access is a lane-aligned ref index.
    wq = p["wq"].reshape(D, heads, hd).transpose(1, 0, 2).astype(jnp.bfloat16)  # (H, D, hd)
    wk = p["wk"].reshape(D, heads, hd).transpose(1, 0, 2).astype(jnp.bfloat16)  # (H, D, hd)
    wv = p["wv"].reshape(D, heads, hd).transpose(1, 0, 2).astype(jnp.bfloat16)  # (H, D, hd)
    wo = p["wo"].reshape(heads, hd, D).astype(jnp.bfloat16)                      # (H, hd, D)
    bq = p["bq"].reshape(heads, 1, hd)
    bk = p["bk"].reshape(heads, 1, hd)
    bv = p["bv"].reshape(heads, 1, hd)

    kernel = functools.partial(_mha_ln_kernel, heads=heads, head_dim=hd,
                               tq=tq, eps=p["eps"])
    return pl.pallas_call(
        kernel,
        out_shape=jax.ShapeDtypeStruct((B, S, D), x.dtype),
        grid=(B, nq),
        in_specs=[
            # Full sequence for this batch (K/V source + residual); batch dim squeezed.
            pl.BlockSpec((None, S, D), lambda b, q: (b, 0, 0)),
            _const_spec((heads, D, hd)),   # wq
            _const_spec((heads, 1, hd)),   # bq
            _const_spec((heads, D, hd)),   # wk
            _const_spec((heads, 1, hd)),   # bk
            _const_spec((heads, D, hd)),   # wv
            _const_spec((heads, 1, hd)),   # bv
            _const_spec((heads, hd, D)),   # wo
            _const_spec((1, D)),           # bo
            _const_spec((1, D)),           # ln gamma
            _const_spec((1, D)),           # ln beta
        ],
        out_specs=pl.BlockSpec((None, tq, D), lambda b, q: (b, q, 0)),
        scratch_shapes=[
            pltpu.VMEM((heads, S, hd), jnp.bfloat16),   # K (per-head, once per batch)
            pltpu.VMEM((heads, S, hd), jnp.bfloat16),   # V
            pltpu.VMEM((tq, D), jnp.float32),           # attention-output accumulator
        ],
        compiler_params=pltpu.CompilerParams(
            dimension_semantics=("parallel", "arbitrary"),
            vmem_limit_bytes=_VMEM_LIMIT_BYTES),
    )(x, wq, bq, wk, bk, wv, bv, wo, p["bo"], p["ln_gamma"], p["ln_beta"])


def ffn_add_layernorm(x, p):
    B, S, D = x.shape
    F = p["w1"].shape[1]
    ts = _choose_seq_tile(S)
    ns = S // ts
    tf = _choose_ff_tile(F)
    nf = F // tf

    w1 = p["w1"].astype(jnp.bfloat16)
    w2 = p["w2"].astype(jnp.bfloat16)

    kernel = functools.partial(_ffn_ln_kernel, eps=p["eps"])
    return pl.pallas_call(
        kernel,
        out_shape=jax.ShapeDtypeStruct((B, S, D), x.dtype),
        grid=(B, ns, nf),
        in_specs=[
            pl.BlockSpec((None, ts, D), lambda b, s, f: (b, s, 0)),  # resident across f
            pl.BlockSpec((D, tf), lambda b, s, f: (0, f)),           # w1 tile
            pl.BlockSpec((1, tf), lambda b, s, f: (0, f)),           # b1 tile
            pl.BlockSpec((tf, D), lambda b, s, f: (f, 0)),           # w2 tile
            _const_spec((1, D)),                                     # b2
            _const_spec((1, D)),                                     # ln gamma
            _const_spec((1, D)),                                     # ln beta
        ],
        out_specs=pl.BlockSpec((None, ts, D), lambda b, s, f: (b, s, 0)),
        scratch_shapes=[pltpu.VMEM((ts, D), jnp.float32)],
        compiler_params=pltpu.CompilerParams(
            dimension_semantics=("parallel", "parallel", "arbitrary"),
            vmem_limit_bytes=_VMEM_LIMIT_BYTES),
    )(x, w1, p["b1"], w2, p["b2"], p["ln_gamma"], p["ln_beta"])


def encoder_block_forward(x, params):
    """Mirrors EncoderBlock.forward (eval mode: dropout = identity, mask = None)."""
    x = mha_add_layernorm(x, params)   # MHA + dropout(id) + residual + shared LayerNorm
    x = ffn_add_layernorm(x, params)   # FFN + dropout(id) + residual + shared LayerNorm
    return x


# ----------------------------------------------------------------------------
# Deterministic parameter initialization
# ----------------------------------------------------------------------------
def init_params(key, dimension, heads, feedforward, epsilon):
    ks = jax.random.split(key, 6)
    s = 0.02
    return {
        "heads": heads,
        "eps": epsilon,
        "wq": s * jax.random.normal(ks[0], (dimension, dimension), jnp.float32),
        "wk": s * jax.random.normal(ks[1], (dimension, dimension), jnp.float32),
        "wv": s * jax.random.normal(ks[2], (dimension, dimension), jnp.float32),
        "wo": s * jax.random.normal(ks[3], (dimension, dimension), jnp.float32),
        "bq": jnp.zeros((1, dimension), jnp.float32),
        "bk": jnp.zeros((1, dimension), jnp.float32),
        "bv": jnp.zeros((1, dimension), jnp.float32),
        "bo": jnp.zeros((1, dimension), jnp.float32),
        "ln_gamma": jnp.ones((1, dimension), jnp.float32),
        "ln_beta": jnp.zeros((1, dimension), jnp.float32),
        "w1": s * jax.random.normal(ks[4], (dimension, feedforward), jnp.float32),
        "b1": jnp.zeros((1, feedforward), jnp.float32),
        "w2": s * jax.random.normal(ks[5], (feedforward, dimension), jnp.float32),
        "b2": jnp.zeros((1, dimension), jnp.float32),
    }


if __name__ == "__main__":
    # Small shapes consistent with the module (dimension divisible by heads).
    B, S, D, H, F = 2, 8, 32, 4, 64
    EPS = 1e-6

    key = jax.random.PRNGKey(0)
    k_x, k_p = jax.random.split(key)
    x = jax.random.normal(k_x, (B, S, D), jnp.float32)
    params = init_params(k_p, dimension=D, heads=H, feedforward=F, epsilon=EPS)

    out = encoder_block_forward(x, params)
    out = jax.block_until_ready(out)

    assert out.shape == (B, S, D)
    assert bool(jnp.all(jnp.isfinite(out)))
    print("KERNEL_OK")
</pallas_src>

<mosaic_0001>
module attributes {stable_mosaic.version = 11 : i64} {
  func.func @_mha_ln_kernel(%arg0: i32, %arg1: i32, %arg2: memref<1x8x32xf32, #tpu.memory_space<vmem>>, %arg3: memref<4x32x8xbf16, #tpu.memory_space<vmem>>, %arg4: memref<4x1x8xf32, #tpu.memory_space<vmem>>, %arg5: memref<4x32x8xbf16, #tpu.memory_space<vmem>>, %arg6: memref<4x1x8xf32, #tpu.memory_space<vmem>>, %arg7: memref<4x32x8xbf16, #tpu.memory_space<vmem>>, %arg8: memref<4x1x8xf32, #tpu.memory_space<vmem>>, %arg9: memref<4x8x32xbf16, #tpu.memory_space<vmem>>, %arg10: memref<1x32xf32, #tpu.memory_space<vmem>>, %arg11: memref<1x32xf32, #tpu.memory_space<vmem>>, %arg12: memref<1x32xf32, #tpu.memory_space<vmem>>, %arg13: memref<1x8x32xf32, #tpu.memory_space<vmem>>, %arg14: memref<4x8x8xbf16, #tpu.memory_space<vmem>>, %arg15: memref<4x8x8xbf16, #tpu.memory_space<vmem>>, %arg16: memref<8x32xf32, #tpu.memory_space<vmem>>) attributes {dimension_semantics = [#tpu.dimension_semantics<parallel>, #tpu.dimension_semantics<arbitrary>], iteration_bounds = array<i64: 2, 1>, scalar_prefetch = 0 : i64, scratch_operands = 3 : i64, tpu.core_type = #tpu.core_type<tc>, window_params = [{transform_indices = @transform_0, window_bounds = array<i64: 1, 8, 32>}, {pipeline_mode = #tpu.pipeline_mode<synchronous>, transform_indices = @transform_1, window_bounds = array<i64: 4, 32, 8>}, {pipeline_mode = #tpu.pipeline_mode<synchronous>, transform_indices = @transform_2, window_bounds = array<i64: 4, 1, 8>}, {pipeline_mode = #tpu.pipeline_mode<synchronous>, transform_indices = @transform_3, window_bounds = array<i64: 4, 32, 8>}, {pipeline_mode = #tpu.pipeline_mode<synchronous>, transform_indices = @transform_4, window_bounds = array<i64: 4, 1, 8>}, {pipeline_mode = #tpu.pipeline_mode<synchronous>, transform_indices = @transform_5, window_bounds = array<i64: 4, 32, 8>}, {pipeline_mode = #tpu.pipeline_mode<synchronous>, transform_indices = @transform_6, window_bounds = array<i64: 4, 1, 8>}, {pipeline_mode = #tpu.pipeline_mode<synchronous>, transform_indices = @transform_7, window_bounds = array<i64: 4, 8, 32>}, {pipeline_mode = #tpu.pipeline_mode<synchronous>, transform_indices = @transform_8, window_bounds = array<i64: 1, 32>}, {pipeline_mode = #tpu.pipeline_mode<synchronous>, transform_indices = @transform_9, window_bounds = array<i64: 1, 32>}, {pipeline_mode = #tpu.pipeline_mode<synchronous>, transform_indices = @transform_10, window_bounds = array<i64: 1, 32>}, {transform_indices = @transform_11, window_bounds = array<i64: 1, 8, 32>}]} {
    %c0_i32 = arith.constant 0 : i32
    %0 = arith.cmpi eq, %arg1, %c0_i32 : i32
    %1 = arith.extui %0 : i1 to i32
    %c0_i32_0 = arith.constant 0 : i32
    %2 = arith.cmpi ne, %1, %c0_i32_0 : i32
    scf.if %2 {
      %c0_121 = arith.constant 0 : index
      %c0_122 = arith.constant 0 : index
      %c0_123 = arith.constant 0 : index
      %179 = vector.load %arg2[%c0_121, %c0_122, %c0_123] : memref<1x8x32xf32, #tpu.memory_space<vmem>>, vector<1x8x32xf32>
      %180 = vector.shape_cast %179 : vector<1x8x32xf32> to vector<8x32xf32>
      %181 = arith.truncf %180 : vector<8x32xf32> to vector<8x32xbf16>
      %c0_124 = arith.constant 0 : index
      %c0_125 = arith.constant 0 : index
      %c0_126 = arith.constant 0 : index
      %182 = vector.load %arg5[%c0_124, %c0_125, %c0_126] : memref<4x32x8xbf16, #tpu.memory_space<vmem>>, vector<1x32x8xbf16>
      %183 = vector.shape_cast %182 : vector<1x32x8xbf16> to vector<32x8xbf16>
      %cst_127 = arith.constant dense<0.000000e+00> : vector<8x8xf32>
      %184 = tpu.matmul %181, %183, %cst_127 {dimension_numbers = #tpu.dot_dimension_numbers<[1], [0], [0], [1], [0, 0, 1, 1], [], []>} : vector<8x32xbf16>, vector<32x8xbf16>, vector<8x8xf32> -> vector<8x8xf32>
      %c0_128 = arith.constant 0 : index
      %c0_129 = arith.constant 0 : index
      %c0_130 = arith.constant 0 : index
      %185 = vector.load %arg6[%c0_128, %c0_129, %c0_130] : memref<4x1x8xf32, #tpu.memory_space<vmem>>, vector<1x1x8xf32>
      %186 = vector.shape_cast %185 : vector<1x1x8xf32> to vector<1x8xf32>
      %187 = vector.broadcast %186 : vector<1x8xf32> to vector<8x8xf32>
      %188 = arith.addf %184, %187 : vector<8x8xf32>
      %c0_131 = arith.constant 0 : index
      %c0_132 = arith.constant 0 : index
      %c0_133 = arith.constant 0 : index
      %189 = vector.load %arg7[%c0_131, %c0_132, %c0_133] : memref<4x32x8xbf16, #tpu.memory_space<vmem>>, vector<1x32x8xbf16>
      %190 = vector.shape_cast %189 : vector<1x32x8xbf16> to vector<32x8xbf16>
      %cst_134 = arith.constant dense<0.000000e+00> : vector<8x8xf32>
      %191 = tpu.matmul %181, %190, %cst_134 {dimension_numbers = #tpu.dot_dimension_numbers<[1], [0], [0], [1], [0, 0, 1, 1], [], []>} : vector<8x32xbf16>, vector<32x8xbf16>, vector<8x8xf32> -> vector<8x8xf32>
      %c0_135 = arith.constant 0 : index
      %c0_136 = arith.constant 0 : index
      %c0_137 = arith.constant 0 : index
      %192 = vector.load %arg8[%c0_135, %c0_136, %c0_137] : memref<4x1x8xf32, #tpu.memory_space<vmem>>, vector<1x1x8xf32>
      %193 = vector.shape_cast %192 : vector<1x1x8xf32> to vector<1x8xf32>
      %194 = vector.broadcast %193 : vector<1x8xf32> to vector<8x8xf32>
      %195 = arith.addf %191, %194 : vector<8x8xf32>
      %196 = arith.truncf %188 : vector<8x8xf32> to vector<8x8xbf16>
      %c0_138 = arith.constant 0 : index
      %c0_139 = arith.constant 0 : index
      %c0_140 = arith.constant 0 : index
      %197 = vector.load %arg14[%c0_138, %c0_139, %c0_140] : memref<4x8x8xbf16, #tpu.memory_space<vmem>>, vector<1x8x8xbf16>
      %198 = vector.shape_cast %197 : vector<1x8x8xbf16> to vector<8x8xbf16>
      %199 = vector.shape_cast %196 : vector<8x8xbf16> to vector<1x8x8xbf16>
      tpu.vector_store %arg14[%c0_138, %c0_139, %c0_140], %199 {strides = array<i32>} : memref<4x8x8xbf16, #tpu.memory_space<vmem>>, vector<1x8x8xbf16>,
      %200 = arith.truncf %195 : vector<8x8xf32> to vector<8x8xbf16>
      %c0_141 = arith.constant 0 : index
      %c0_142 = arith.constant 0 : index
      %c0_143 = arith.constant 0 : index
      %201 = vector.load %arg15[%c0_141, %c0_142, %c0_143] : memref<4x8x8xbf16, #tpu.memory_space<vmem>>, vector<1x8x8xbf16>
      %202 = vector.shape_cast %201 : vector<1x8x8xbf16> to vector<8x8xbf16>
      %203 = vector.shape_cast %200 : vector<8x8xbf16> to vector<1x8x8xbf16>
      tpu.vector_store %arg15[%c0_141, %c0_142, %c0_143], %203 {strides = array<i32>} : memref<4x8x8xbf16, #tpu.memory_space<vmem>>, vector<1x8x8xbf16>,
      %c1_144 = arith.constant 1 : index
      %c0_145 = arith.constant 0 : index
      %c0_146 = arith.constant 0 : index
      %204 = vector.load %arg5[%c1_144, %c0_145, %c0_146] : memref<4x32x8xbf16, #tpu.memory_space<vmem>>, vector<1x32x8xbf16>
      %205 = vector.shape_cast %204 : vector<1x32x8xbf16> to vector<32x8xbf16>
      %cst_147 = arith.constant dense<0.000000e+00> : vector<8x8xf32>
      %206 = tpu.matmul %181, %205, %cst_147 {dimension_numbers = #tpu.dot_dimension_numbers<[1], [0], [0], [1], [0, 0, 1, 1], [], []>} : vector<8x32xbf16>, vector<32x8xbf16>, vector<8x8xf32> -> vector<8x8xf32>
      %c1_148 = arith.constant 1 : index
      %c0_149 = arith.constant 0 : index
      %c0_150 = arith.constant 0 : index
      %207 = vector.load %arg6[%c1_148, %c0_149, %c0_150] : memref<4x1x8xf32, #tpu.memory_space<vmem>>, vector<1x1x8xf32>
      %208 = vector.shape_cast %207 : vector<1x1x8xf32> to vector<1x8xf32>
      %209 = vector.broadcast %208 : vector<1x8xf32> to vector<8x8xf32>
      %210 = arith.addf %206, %209 : vector<8x8xf32>
      %c1_151 = arith.constant 1 : index
      %c0_152 = arith.constant 0 : index
      %c0_153 = arith.constant 0 : index
      %211 = vector.load %arg7[%c1_151, %c0_152, %c0_153] : memref<4x32x8xbf16, #tpu.memory_space<vmem>>, vector<1x32x8xbf16>
      %212 = vector.shape_cast %211 : vector<1x32x8xbf16> to vector<32x8xbf16>
      %cst_154 = arith.constant dense<0.000000e+00> : vector<8x8xf32>
      %213 = tpu.matmul %181, %212, %cst_154 {dimension_numbers = #tpu.dot_dimension_numbers<[1], [0], [0], [1], [0, 0, 1, 1], [], []>} : vector<8x32xbf16>, vector<32x8xbf16>, vector<8x8xf32> -> vector<8x8xf32>
      %c1_155 = arith.constant 1 : index
      %c0_156 = arith.constant 0 : index
      %c0_157 = arith.constant 0 : index
      %214 = vector.load %arg8[%c1_155, %c0_156, %c0_157] : memref<4x1x8xf32, #tpu.memory_space<vmem>>, vector<1x1x8xf32>
      %215 = vector.shape_cast %214 : vector<1x1x8xf32> to vector<1x8xf32>
      %216 = vector.broadcast %215 : vector<1x8xf32> to vector<8x8xf32>
      %217 = arith.addf %213, %216 : vector<8x8xf32>
      %218 = arith.truncf %210 : vector<8x8xf32> to vector<8x8xbf16>
      %c1_158 = arith.constant 1 : index
      %c0_159 = arith.constant 0 : index
      %c0_160 = arith.constant 0 : index
      %219 = vector.load %arg14[%c1_158, %c0_159, %c0_160] : memref<4x8x8xbf16, #tpu.memory_space<vmem>>, vector<1x8x8xbf16>
      %220 = vector.shape_cast %219 : vector<1x8x8xbf16> to vector<8x8xbf16>
      %221 = vector.shape_cast %218 : vector<8x8xbf16> to vector<1x8x8xbf16>
      tpu.vector_store %arg14[%c1_158, %c0_159, %c0_160], %221 {strides = array<i32>} : memref<4x8x8xbf16, #tpu.memory_space<vmem>>, vector<1x8x8xbf16>,
      %222 = arith.truncf %217 : vector<8x8xf32> to vector<8x8xbf16>
      %c1_161 = arith.constant 1 : index
      %c0_162 = arith.constant 0 : index
      %c0_163 = arith.constant 0 : index
      %223 = vector.load %arg15[%c1_161, %c0_162, %c0_163] : memref<4x8x8xbf16, #tpu.memory_space<vmem>>, vector<1x8x8xbf16>
      %224 = vector.shape_cast %223 : vector<1x8x8xbf16> to vector<8x8xbf16>
      %225 = vector.shape_cast %222 : vector<8x8xbf16> to vector<1x8x8xbf16>
      tpu.vector_store %arg15[%c1_161, %c0_162, %c0_163], %225 {strides = array<i32>} : memref<4x8x8xbf16, #tpu.memory_space<vmem>>, vector<1x8x8xbf16>,
      %c2_164 = arith.constant 2 : index
      %c0_165 = arith.constant 0 : index
      %c0_166 = arith.constant 0 : index
      %226 = vector.load %arg5[%c2_164, %c0_165, %c0_166] : memref<4x32x8xbf16, #tpu.memory_space<vmem>>, vector<1x32x8xbf16>
      %227 = vector.shape_cast %226 : vector<1x32x8xbf16> to vector<32x8xbf16>
      %cst_167 = arith.constant dense<0.000000e+00> : vector<8x8xf32>
      %228 = tpu.matmul %181, %227, %cst_167 {dimension_numbers = #tpu.dot_dimension_numbers<[1], [0], [0], [1], [0, 0, 1, 1], [], []>} : vector<8x32xbf16>, vector<32x8xbf16>, vector<8x8xf32> -> vector<8x8xf32>
      %c2_168 = arith.constant 2 : index
      %c0_169 = arith.constant 0 : index
      %c0_170 = arith.constant 0 : index
      %229 = vector.load %arg6[%c2_168, %c0_169, %c0_170] : memref<4x1x8xf32, #tpu.memory_space<vmem>>, vector<1x1x8xf32>
      %230 = vector.shape_cast %229 : vector<1x1x8xf32> to vector<1x8xf32>
      %231 = vector.broadcast %230 : vector<1x8xf32> to vector<8x8xf32>
      %232 = arith.addf %228, %231 : vector<8x8xf32>
      %c2_171 = arith.constant 2 : index
      %c0_172 = arith.constant 0 : index
      %c0_173 = arith.constant 0 : index
      %233 = vector.load %arg7[%c2_171, %c0_172, %c0_173] : memref<4x32x8xbf16, #tpu.memory_space<vmem>>, vector<1x32x8xbf16>
      %234 = vector.shape_cast %233 : vector<1x32x8xbf16> to vector<32x8xbf16>
      %cst_174 = arith.constant dense<0.000000e+00> : vector<8x8xf32>
      %235 = tpu.matmul %181, %234, %cst_174 {dimension_numbers = #tpu.dot_dimension_numbers<[1], [0], [0], [1], [0, 0, 1, 1], [], []>} : vector<8x32xbf16>, vector<32x8xbf16>, vector<8x8xf32> -> vector<8x8xf32>
      %c2_175 = arith.constant 2 : index
      %c0_176 = arith.constant 0 : index
      %c0_177 = arith.constant 0 : index
      %236 = vector.load %arg8[%c2_175, %c0_176, %c0_177] : memref<4x1x8xf32, #tpu.memory_space<vmem>>, vector<1x1x8xf32>
      %237 = vector.shape_cast %236 : vector<1x1x8xf32> to vector<1x8xf32>
      %238 = vector.broadcast %237 : vector<1x8xf32> to vector<8x8xf32>
      %239 = arith.addf %235, %238 : vector<8x8xf32>
      %240 = arith.truncf %232 : vector<8x8xf32> to vector<8x8xbf16>
      %c2_178 = arith.constant 2 : index
      %c0_179 = arith.constant 0 : index
      %c0_180 = arith.constant 0 : index
      %241 = vector.load %arg14[%c2_178, %c0_179, %c0_180] : memref<4x8x8xbf16, #tpu.memory_space<vmem>>, vector<1x8x8xbf16>
      %242 = vector.shape_cast %241 : vector<1x8x8xbf16> to vector<8x8xbf16>
      %243 = vector.shape_cast %240 : vector<8x8xbf16> to vector<1x8x8xbf16>
      tpu.vector_store %arg14[%c2_178, %c0_179, %c0_180], %243 {strides = array<i32>} : memref<4x8x8xbf16, #tpu.memory_space<vmem>>, vector<1x8x8xbf16>,
      %244 = arith.truncf %239 : vector<8x8xf32> to vector<8x8xbf16>
      %c2_181 = arith.constant 2 : index
      %c0_182 = arith.constant 0 : index
      %c0_183 = arith.constant 0 : index
      %245 = vector.load %arg15[%c2_181, %c0_182, %c0_183] : memref<4x8x8xbf16, #tpu.memory_space<vmem>>, vector<1x8x8xbf16>
      %246 = vector.shape_cast %245 : vector<1x8x8xbf16> to vector<8x8xbf16>
      %247 = vector.shape_cast %244 : vector<8x8xbf16> to vector<1x8x8xbf16>
      tpu.vector_store %arg15[%c2_181, %c0_182, %c0_183], %247 {strides = array<i32>} : memref<4x8x8xbf16, #tpu.memory_space<vmem>>, vector<1x8x8xbf16>,
      %c3_184 = arith.constant 3 : index
      %c0_185 = arith.constant 0 : index
      %c0_186 = arith.constant 0 : index
      %248 = vector.load %arg5[%c3_184, %c0_185, %c0_186] : memref<4x32x8xbf16, #tpu.memory_space<vmem>>, vector<1x32x8xbf16>
      %249 = vector.shape_cast %248 : vector<1x32x8xbf16> to vector<32x8xbf16>
      %cst_187 = arith.constant dense<0.000000e+00> : vector<8x8xf32>
      %250 = tpu.matmul %181, %249, %cst_187 {dimension_numbers = #tpu.dot_dimension_numbers<[1], [0], [0], [1], [0, 0, 1, 1], [], []>} : vector<8x32xbf16>, vector<32x8xbf16>, vector<8x8xf32> -> vector<8x8xf32>
      %c3_188 = arith.constant 3 : index
      %c0_189 = arith.constant 0 : index
      %c0_190 = arith.constant 0 : index
      %251 = vector.load %arg6[%c3_188, %c0_189, %c0_190] : memref<4x1x8xf32, #tpu.memory_space<vmem>>, vector<1x1x8xf32>
      %252 = vector.shape_cast %251 : vector<1x1x8xf32> to vector<1x8xf32>
      %253 = vector.broadcast %252 : vector<1x8xf32> to vector<8x8xf32>
      %254 = arith.addf %250, %253 : vector<8x8xf32>
      %c3_191 = arith.constant 3 : index
      %c0_192 = arith.constant 0 : index
      %c0_193 = arith.constant 0 : index
      %255 = vector.load %arg7[%c3_191, %c0_192, %c0_193] : memref<4x32x8xbf16, #tpu.memory_space<vmem>>, vector<1x32x8xbf16>
      %256 = vector.shape_cast %255 : vector<1x32x8xbf16> to vector<32x8xbf16>
      %cst_194 = arith.constant dense<0.000000e+00> : vector<8x8xf32>
      %257 = tpu.matmul %181, %256, %cst_194 {dimension_numbers = #tpu.dot_dimension_numbers<[1], [0], [0], [1], [0, 0, 1, 1], [], []>} : vector<8x32xbf16>, vector<32x8xbf16>, vector<8x8xf32> -> vector<8x8xf32>
      %c3_195 = arith.constant 3 : index
      %c0_196 = arith.constant 0 : index
      %c0_197 = arith.constant 0 : index
      %258 = vector.load %arg8[%c3_195, %c0_196, %c0_197] : memref<4x1x8xf32, #tpu.memory_space<vmem>>, vector<1x1x8xf32>
      %259 = vector.shape_cast %258 : vector<1x1x8xf32> to vector<1x8xf32>
      %260 = vector.broadcast %259 : vector<1x8xf32> to vector<8x8xf32>
      %261 = arith.addf %257, %260 : vector<8x8xf32>
      %262 = arith.truncf %254 : vector<8x8xf32> to vector<8x8xbf16>
      %c3_198 = arith.constant 3 : index
      %c0_199 = arith.constant 0 : index
      %c0_200 = arith.constant 0 : index
      %263 = vector.load %arg14[%c3_198, %c0_199, %c0_200] : memref<4x8x8xbf16, #tpu.memory_space<vmem>>, vector<1x8x8xbf16>
      %264 = vector.shape_cast %263 : vector<1x8x8xbf16> to vector<8x8xbf16>
      %265 = vector.shape_cast %262 : vector<8x8xbf16> to vector<1x8x8xbf16>
      tpu.vector_store %arg14[%c3_198, %c0_199, %c0_200], %265 {strides = array<i32>} : memref<4x8x8xbf16, #tpu.memory_space<vmem>>, vector<1x8x8xbf16>,
      %266 = arith.truncf %261 : vector<8x8xf32> to vector<8x8xbf16>
      %c3_201 = arith.constant 3 : index
      %c0_202 = arith.constant 0 : index
      %c0_203 = arith.constant 0 : index
      %267 = vector.load %arg15[%c3_201, %c0_202, %c0_203] : memref<4x8x8xbf16, #tpu.memory_space<vmem>>, vector<1x8x8xbf16>
      %268 = vector.shape_cast %267 : vector<1x8x8xbf16> to vector<8x8xbf16>
      %269 = vector.shape_cast %266 : vector<8x8xbf16> to vector<1x8x8xbf16>
      tpu.vector_store %arg15[%c3_201, %c0_202, %c0_203], %269 {strides = array<i32>} : memref<4x8x8xbf16, #tpu.memory_space<vmem>>, vector<1x8x8xbf16>,
    } else {
    }
    %c8_i32 = arith.constant 8 : i32
    %3 = arith.muli %arg1, %c8_i32 : i32
    %4 = tpu.assume_multiple %3, 8 : i32
    %c0 = arith.constant 0 : index
    %5 = arith.index_cast %4 : i32 to index
    %c0_1 = arith.constant 0 : index
    %6 = vector.load %arg2[%c0, %5, %c0_1] : memref<1x8x32xf32, #tpu.memory_space<vmem>>, vector<1x8x32xf32>
    %7 = vector.shape_cast %6 : vector<1x8x32xf32> to vector<8x32xf32>
    %8 = arith.truncf %7 : vector<8x32xf32> to vector<8x32xbf16>
    %cst = arith.constant 0.000000e+00 : f32
    %9 = vector.broadcast %cst : f32 to vector<8x32xf32>
    %c0_2 = arith.constant 0 : index
    %c0_3 = arith.constant 0 : index
    %10 = vector.load %arg16[%c0_2, %c0_3] : memref<8x32xf32, #tpu.memory_space<vmem>>, vector<8x32xf32>
    tpu.vector_store %arg16[%c0_2, %c0_3], %9 {strides = array<i32>} : memref<8x32xf32, #tpu.memory_space<vmem>>, vector<8x32xf32>,
    %c0_4 = arith.constant 0 : index
    %c0_5 = arith.constant 0 : index
    %c0_6 = arith.constant 0 : index
    %11 = vector.load %arg3[%c0_4, %c0_5, %c0_6] : memref<4x32x8xbf16, #tpu.memory_space<vmem>>, vector<1x32x8xbf16>
    %12 = vector.shape_cast %11 : vector<1x32x8xbf16> to vector<32x8xbf16>
    %cst_7 = arith.constant dense<0.000000e+00> : vector<8x8xf32>
    %13 = tpu.matmul %8, %12, %cst_7 {dimension_numbers = #tpu.dot_dimension_numbers<[1], [0], [0], [1], [0, 0, 1, 1], [], []>} : vector<8x32xbf16>, vector<32x8xbf16>, vector<8x8xf32> -> vector<8x8xf32>
    %c0_8 = arith.constant 0 : index
    %c0_9 = arith.constant 0 : index
    %c0_10 = arith.constant 0 : index
    %14 = vector.load %arg4[%c0_8, %c0_9, %c0_10] : memref<4x1x8xf32, #tpu.memory_space<vmem>>, vector<1x1x8xf32>
    %15 = vector.shape_cast %14 : vector<1x1x8xf32> to vector<1x8xf32>
    %16 = vector.broadcast %15 : vector<1x8xf32> to vector<8x8xf32>
    %17 = arith.addf %13, %16 : vector<8x8xf32>
    %18 = arith.truncf %17 : vector<8x8xf32> to vector<8x8xbf16>
    %c0_11 = arith.constant 0 : index
    %c0_12 = arith.constant 0 : index
    %c0_13 = arith.constant 0 : index
    %19 = vector.load %arg14[%c0_11, %c0_12, %c0_13] : memref<4x8x8xbf16, #tpu.memory_space<vmem>>, vector<1x8x8xbf16>
    %20 = vector.shape_cast %19 : vector<1x8x8xbf16> to vector<8x8xbf16>
    %cst_14 = arith.constant dense<0.000000e+00> : vector<8x8xf32>
    %21 = tpu.matmul %18, %20, %cst_14 {dimension_numbers = #tpu.dot_dimension_numbers<[1], [1], [0], [0], [0, 0, 1, 0], [], []>} : vector<8x8xbf16>, vector<8x8xbf16>, vector<8x8xf32> -> vector<8x8xf32>
    %cst_15 = arith.constant 0.353553385 : f32
    %22 = vector.broadcast %cst_15 : f32 to vector<8x8xf32>
    %23 = arith.mulf %21, %22 : vector<8x8xf32>
    %cst_16 = arith.constant dense<0xFF800000> : vector<8xf32>
    %24 = vector.multi_reduction <maximumf>, %23, %cst_16 [1] : vector<8x8xf32> to vector<8xf32>
    %25 = vector.shape_cast %24 : vector<8xf32> to vector<8x1xf32>
    %26 = vector.broadcast %25 : vector<8x1xf32> to vector<8x8xf32>
    %27 = arith.subf %23, %26 : vector<8x8xf32>
    %28 = math.exp %27 : vector<8x8xf32>
    %cst_17 = arith.constant dense<0.000000e+00> : vector<8xf32>
    %29 = vector.multi_reduction <add>, %28, %cst_17 [1] : vector<8x8xf32> to vector<8xf32>
    %30 = vector.shape_cast %29 : vector<8xf32> to vector<8x1xf32>
    %31 = tpu.reciprocal %30 {approx = true} : vector<8x1xf32> -> vector<8x1xf32>
    %32 = vector.broadcast %31 : vector<8x1xf32> to vector<8x8xf32>
    %33 = arith.mulf %28, %32 : vector<8x8xf32>
    %34 = arith.truncf %33 : vector<8x8xf32> to vector<8x8xbf16>
    %c0_18 = arith.constant 0 : index
    %c0_19 = arith.constant 0 : index
    %c0_20 = arith.constant 0 : index
    %35 = vector.load %arg15[%c0_18, %c0_19, %c0_20] : memref<4x8x8xbf16, #tpu.memory_space<vmem>>, vector<1x8x8xbf16>
    %36 = vector.shape_cast %35 : vector<1x8x8xbf16> to vector<8x8xbf16>
    %cst_21 = arith.constant dense<0.000000e+00> : vector<8x8xf32>
    %37 = tpu.matmul %34, %36, %cst_21 {dimension_numbers = #tpu.dot_dimension_numbers<[1], [0], [0], [1], [0, 0, 1, 1], [], []>} : vector<8x8xbf16>, vector<8x8xbf16>, vector<8x8xf32> -> vector<8x8xf32>
    %c0_22 = arith.constant 0 : index
    %c0_23 = arith.constant 0 : index
    %38 = vector.load %arg16[%c0_22, %c0_23] : memref<8x32xf32, #tpu.memory_space<vmem>>, vector<8x32xf32>
    %39 = arith.truncf %37 : vector<8x8xf32> to vector<8x8xbf16>
    %c0_24 = arith.constant 0 : index
    %c0_25 = arith.constant 0 : index
    %c0_26 = arith.constant 0 : index
    %40 = vector.load %arg9[%c0_24, %c0_25, %c0_26] : memref<4x8x32xbf16, #tpu.memory_space<vmem>>, vector<1x8x32xbf16>
    %41 = vector.shape_cast %40 : vector<1x8x32xbf16> to vector<8x32xbf16>
    %cst_27 = arith.constant dense<0.000000e+00> : vector<8x32xf32>
    %42 = tpu.matmul %39, %41, %cst_27 {dimension_numbers = #tpu.dot_dimension_numbers<[1], [0], [0], [1], [0, 0, 1, 1], [], []>} : vector<8x8xbf16>, vector<8x32xbf16>, vector<8x32xf32> -> vector<8x32xf32>
    %43 = arith.addf %38, %42 : vector<8x32xf32>
    %c0_28 = arith.constant 0 : index
    %c0_29 = arith.constant 0 : index
    %44 = vector.load %arg16[%c0_28, %c0_29] : memref<8x32xf32, #tpu.memory_space<vmem>>, vector<8x32xf32>
    tpu.vector_store %arg16[%c0_28, %c0_29], %43 {strides = array<i32>} : memref<8x32xf32, #tpu.memory_space<vmem>>, vector<8x32xf32>,
    %c1 = arith.constant 1 : index
    %c0_30 = arith.constant 0 : index
    %c0_31 = arith.constant 0 : index
    %45 = vector.load %arg3[%c1, %c0_30, %c0_31] : memref<4x32x8xbf16, #tpu.memory_space<vmem>>, vector<1x32x8xbf16>
    %46 = vector.shape_cast %45 : vector<1x32x8xbf16> to vector<32x8xbf16>
    %cst_32 = arith.constant dense<0.000000e+00> : vector<8x8xf32>
    %47 = tpu.matmul %8, %46, %cst_32 {dimension_numbers = #tpu.dot_dimension_numbers<[1], [0], [0], [1], [0, 0, 1, 1], [], []>} : vector<8x32xbf16>, vector<32x8xbf16>, vector<8x8xf32> -> vector<8x8xf32>
    %c1_33 = arith.constant 1 : index
    %c0_34 = arith.constant 0 : index
    %c0_35 = arith.constant 0 : index
    %48 = vector.load %arg4[%c1_33, %c0_34, %c0_35] : memref<4x1x8xf32, #tpu.memory_space<vmem>>, vector<1x1x8xf32>
    %49 = vector.shape_cast %48 : vector<1x1x8xf32> to vector<1x8xf32>
    %50 = vector.broadcast %49 : vector<1x8xf32> to vector<8x8xf32>
    %51 = arith.addf %47, %50 : vector<8x8xf32>
    %52 = arith.truncf %51 : vector<8x8xf32> to vector<8x8xbf16>
    %c1_36 = arith.constant 1 : index
    %c0_37 = arith.constant 0 : index
    %c0_38 = arith.constant 0 : index
    %53 = vector.load %arg14[%c1_36, %c0_37, %c0_38] : memref<4x8x8xbf16, #tpu.memory_space<vmem>>, vector<1x8x8xbf16>
    %54 = vector.shape_cast %53 : vector<1x8x8xbf16> to vector<8x8xbf16>
    %cst_39 = arith.constant dense<0.000000e+00> : vector<8x8xf32>
    %55 = tpu.matmul %52, %54, %cst_39 {dimension_numbers = #tpu.dot_dimension_numbers<[1], [1], [0], [0], [0, 0, 1, 0], [], []>} : vector<8x8xbf16>, vector<8x8xbf16>, vector<8x8xf32> -> vector<8x8xf32>
    %cst_40 = arith.constant 0.353553385 : f32
    %56 = vector.broadcast %cst_40 : f32 to vector<8x8xf32>
    %57 = arith.mulf %55, %56 : vector<8x8xf32>
    %cst_41 = arith.constant dense<0xFF800000> : vector<8xf32>
    %58 = vector.multi_reduction <maximumf>, %57, %cst_41 [1] : vector<8x8xf32> to vector<8xf32>
    %59 = vector.shape_cast %58 : vector<8xf32> to vector<8x1xf32>
    %60 = vector.broadcast %59 : vector<8x1xf32> to vector<8x8xf32>
    %61 = arith.subf %57, %60 : vector<8x8xf32>
    %62 = math.exp %61 : vector<8x8xf32>
    %cst_42 = arith.constant dense<0.000000e+00> : vector<8xf32>
    %63 = vector.multi_reduction <add>, %62, %cst_42 [1] : vector<8x8xf32> to vector<8xf32>
    %64 = vector.shape_cast %63 : vector<8xf32> to vector<8x1xf32>
    %65 = tpu.reciprocal %64 {approx = true} : vector<8x1xf32> -> vector<8x1xf32>
    %66 = vector.broadcast %65 : vector<8x1xf32> to vector<8x8xf32>
    %67 = arith.mulf %62, %66 : vector<8x8xf32>
    %68 = arith.truncf %67 : vector<8x8xf32> to vector<8x8xbf16>
    %c1_43 = arith.constant 1 : index
    %c0_44 = arith.constant 0 : index
    %c0_45 = arith.constant 0 : index
    %69 = vector.load %arg15[%c1_43, %c0_44, %c0_45] : memref<4x8x8xbf16, #tpu.memory_space<vmem>>, vector<1x8x8xbf16>
    %70 = vector.shape_cast %69 : vector<1x8x8xbf16> to vector<8x8xbf16>
    %cst_46 = arith.constant dense<0.000000e+00> : vector<8x8xf32>
    %71 = tpu.matmul %68, %70, %cst_46 {dimension_numbers = #tpu.dot_dimension_numbers<[1], [0], [0], [1], [0, 0, 1, 1], [], []>} : vector<8x8xbf16>, vector<8x8xbf16>, vector<8x8xf32> -> vector<8x8xf32>
    %c0_47 = arith.constant 0 : index
    %c0_48 = arith.constant 0 : index
    %72 = vector.load %arg16[%c0_47, %c0_48] : memref<8x32xf32, #tpu.memory_space<vmem>>, vector<8x32xf32>
    %73 = arith.truncf %71 : vector<8x8xf32> to vector<8x8xbf16>
    %c1_49 = arith.constant 1 : index
    %c0_50 = arith.constant 0 : index
    %c0_51 = arith.constant 0 : index
    %74 = vector.load %arg9[%c1_49, %c0_50, %c0_51] : memref<4x8x32xbf16, #tpu.memory_space<vmem>>, vector<1x8x32xbf16>
    %75 = vector.shape_cast %74 : vector<1x8x32xbf16> to vector<8x32xbf16>
    %cst_52 = arith.constant dense<0.000000e+00> : vector<8x32xf32>
    %76 = tpu.matmul %73, %75, %cst_52 {dimension_numbers = #tpu.dot_dimension_numbers<[1], [0], [0], [1], [0, 0, 1, 1], [], []>} : vector<8x8xbf16>, vector<8x32xbf16>, vector<8x32xf32> -> vector<8x32xf32>
    %77 = arith.addf %72, %76 : vector<8x32xf32>
    %c0_53 = arith.constant 0 : index
    %c0_54 = arith.constant 0 : index
    %78 = vector.load %arg16[%c0_53, %c0_54] : memref<8x32xf32, #tpu.memory_space<vmem>>, vector<8x32xf32>
    tpu.vector_store %arg16[%c0_53, %c0_54], %77 {strides = array<i32>} : memref<8x32xf32, #tpu.memory_space<vmem>>, vector<8x32xf32>,
    %c2 = arith.constant 2 : index
    %c0_55 = arith.constant 0 : index
    %c0_56 = arith.constant 0 : index
    %79 = vector.load %arg3[%c2, %c0_55, %c0_56] : memref<4x32x8xbf16, #tpu.memory_space<vmem>>, vector<1x32x8xbf16>
    %80 = vector.shape_cast %79 : vector<1x32x8xbf16> to vector<32x8xbf16>
    %cst_57 = arith.constant dense<0.000000e+00> : vector<8x8xf32>
    %81 = tpu.matmul %8, %80, %cst_57 {dimension_numbers = #tpu.dot_dimension_numbers<[1], [0], [0], [1], [0, 0, 1, 1], [], []>} : vector<8x32xbf16>, vector<32x8xbf16>, vector<8x8xf32> -> vector<8x8xf32>
    %c2_58 = arith.constant 2 : index
    %c0_59 = arith.constant 0 : index
    %c0_60 = arith.constant 0 : index
    %82 = vector.load %arg4[%c2_58, %c0_59, %c0_60] : memref<4x1x8xf32, #tpu.memory_space<vmem>>, vector<1x1x8xf32>
    %83 = vector.shape_cast %82 : vector<1x1x8xf32> to vector<1x8xf32>
    %84 = vector.broadcast %83 : vector<1x8xf32> to vector<8x8xf32>
    %85 = arith.addf %81, %84 : vector<8x8xf32>
    %86 = arith.truncf %85 : vector<8x8xf32> to vector<8x8xbf16>
    %c2_61 = arith.constant 2 : index
    %c0_62 = arith.constant 0 : index
    %c0_63 = arith.constant 0 : index
    %87 = vector.load %arg14[%c2_61, %c0_62, %c0_63] : memref<4x8x8xbf16, #tpu.memory_space<vmem>>, vector<1x8x8xbf16>
    %88 = vector.shape_cast %87 : vector<1x8x8xbf16> to vector<8x8xbf16>
    %cst_64 = arith.constant dense<0.000000e+00> : vector<8x8xf32>
    %89 = tpu.matmul %86, %88, %cst_64 {dimension_numbers = #tpu.dot_dimension_numbers<[1], [1], [0], [0], [0, 0, 1, 0], [], []>} : vector<8x8xbf16>, vector<8x8xbf16>, vector<8x8xf32> -> vector<8x8xf32>
    %cst_65 = arith.constant 0.353553385 : f32
    %90 = vector.broadcast %cst_65 : f32 to vector<8x8xf32>
    %91 = arith.mulf %89, %90 : vector<8x8xf32>
    %cst_66 = arith.constant dense<0xFF800000> : vector<8xf32>
    %92 = vector.multi_reduction <maximumf>, %91, %cst_66 [1] : vector<8x8xf32> to vector<8xf32>
    %93 = vector.shape_cast %92 : vector<8xf32> to vector<8x1xf32>
    %94 = vector.broadcast %93 : vector<8x1xf32> to vector<8x8xf32>
    %95 = arith.subf %91, %94 : vector<8x8xf32>
    %96 = math.exp %95 : vector<8x8xf32>
    %cst_67 = arith.constant dense<0.000000e+00> : vector<8xf32>
    %97 = vector.multi_reduction <add>, %96, %cst_67 [1] : vector<8x8xf32> to vector<8xf32>
    %98 = vector.shape_cast %97 : vector<8xf32> to vector<8x1xf32>
    %99 = tpu.reciprocal %98 {approx = true} : vector<8x1xf32> -> vector<8x1xf32>
    %100 = vector.broadcast %99 : vector<8x1xf32> to vector<8x8xf32>
    %101 = arith.mulf %96, %100 : vector<8x8xf32>
    %102 = arith.truncf %101 : vector<8x8xf32> to vector<8x8xbf16>
    %c2_68 = arith.constant 2 : index
    %c0_69 = arith.constant 0 : index
    %c0_70 = arith.constant 0 : index
    %103 = vector.load %arg15[%c2_68, %c0_69, %c0_70] : memref<4x8x8xbf16, #tpu.memory_space<vmem>>, vector<1x8x8xbf16>
    %104 = vector.shape_cast %103 : vector<1x8x8xbf16> to vector<8x8xbf16>
    %cst_71 = arith.constant dense<0.000000e+00> : vector<8x8xf32>
    %105 = tpu.matmul %102, %104, %cst_71 {dimension_numbers = #tpu.dot_dimension_numbers<[1], [0], [0], [1], [0, 0, 1, 1], [], []>} : vector<8x8xbf16>, vector<8x8xbf16>, vector<8x8xf32> -> vector<8x8xf32>
    %c0_72 = arith.constant 0 : index
    %c0_73 = arith.constant 0 : index
    %106 = vector.load %arg16[%c0_72, %c0_73] : memref<8x32xf32, #tpu.memory_space<vmem>>, vector<8x32xf32>
    %107 = arith.truncf %105 : vector<8x8xf32> to vector<8x8xbf16>
    %c2_74 = arith.constant 2 : index
    %c0_75 = arith.constant 0 : index
    %c0_76 = arith.constant 0 : index
    %108 = vector.load %arg9[%c2_74, %c0_75, %c0_76] : memref<4x8x32xbf16, #tpu.memory_space<vmem>>, vector<1x8x32xbf16>
    %109 = vector.shape_cast %108 : vector<1x8x32xbf16> to vector<8x32xbf16>
    %cst_77 = arith.constant dense<0.000000e+00> : vector<8x32xf32>
    %110 = tpu.matmul %107, %109, %cst_77 {dimension_numbers = #tpu.dot_dimension_numbers<[1], [0], [0], [1], [0, 0, 1, 1], [], []>} : vector<8x8xbf16>, vector<8x32xbf16>, vector<8x32xf32> -> vector<8x32xf32>
    %111 = arith.addf %106, %110 : vector<8x32xf32>
    %c0_78 = arith.constant 0 : index
    %c0_79 = arith.constant 0 : index
    %112 = vector.load %arg16[%c0_78, %c0_79] : memref<8x32xf32, #tpu.memory_space<vmem>>, vector<8x32xf32>
    tpu.vector_store %arg16[%c0_78, %c0_79], %111 {strides = array<i32>} : memref<8x32xf32, #tpu.memory_space<vmem>>, vector<8x32xf32>,
    %c3 = arith.constant 3 : index
    %c0_80 = arith.constant 0 : index
    %c0_81 = arith.constant 0 : index
    %113 = vector.load %arg3[%c3, %c0_80, %c0_81] : memref<4x32x8xbf16, #tpu.memory_space<vmem>>, vector<1x32x8xbf16>
    %114 = vector.shape_cast %113 : vector<1x32x8xbf16> to vector<32x8xbf16>
    %cst_82 = arith.constant dense<0.000000e+00> : vector<8x8xf32>
    %115 = tpu.matmul %8, %114, %cst_82 {dimension_numbers = #tpu.dot_dimension_numbers<[1], [0], [0], [1], [0, 0, 1, 1], [], []>} : vector<8x32xbf16>, vector<32x8xbf16>, vector<8x8xf32> -> vector<8x8xf32>
    %c3_83 = arith.constant 3 : index
    %c0_84 = arith.constant 0 : index
    %c0_85 = arith.constant 0 : index
    %116 = vector.load %arg4[%c3_83, %c0_84, %c0_85] : memref<4x1x8xf32, #tpu.memory_space<vmem>>, vector<1x1x8xf32>
    %117 = vector.shape_cast %116 : vector<1x1x8xf32> to vector<1x8xf32>
    %118 = vector.broadcast %117 : vector<1x8xf32> to vector<8x8xf32>
    %119 = arith.addf %115, %118 : vector<8x8xf32>
    %120 = arith.truncf %119 : vector<8x8xf32> to vector<8x8xbf16>
    %c3_86 = arith.constant 3 : index
    %c0_87 = arith.constant 0 : index
    %c0_88 = arith.constant 0 : index
    %121 = vector.load %arg14[%c3_86, %c0_87, %c0_88] : memref<4x8x8xbf16, #tpu.memory_space<vmem>>, vector<1x8x8xbf16>
    %122 = vector.shape_cast %121 : vector<1x8x8xbf16> to vector<8x8xbf16>
    %cst_89 = arith.constant dense<0.000000e+00> : vector<8x8xf32>
    %123 = tpu.matmul %120, %122, %cst_89 {dimension_numbers = #tpu.dot_dimension_numbers<[1], [1], [0], [0], [0, 0, 1, 0], [], []>} : vector<8x8xbf16>, vector<8x8xbf16>, vector<8x8xf32> -> vector<8x8xf32>
    %cst_90 = arith.constant 0.353553385 : f32
    %124 = vector.broadcast %cst_90 : f32 to vector<8x8xf32>
    %125 = arith.mulf %123, %124 : vector<8x8xf32>
    %cst_91 = arith.constant dense<0xFF800000> : vector<8xf32>
    %126 = vector.multi_reduction <maximumf>, %125, %cst_91 [1] : vector<8x8xf32> to vector<8xf32>
    %127 = vector.shape_cast %126 : vector<8xf32> to vector<8x1xf32>
    %128 = vector.broadcast %127 : vector<8x1xf32> to vector<8x8xf32>
    %129 = arith.subf %125, %128 : vector<8x8xf32>
    %130 = math.exp %129 : vector<8x8xf32>
    %cst_92 = arith.constant dense<0.000000e+00> : vector<8xf32>
    %131 = vector.multi_reduction <add>, %130, %cst_92 [1] : vector<8x8xf32> to vector<8xf32>
    %132 = vector.shape_cast %131 : vector<8xf32> to vector<8x1xf32>
    %133 = tpu.reciprocal %132 {approx = true} : vector<8x1xf32> -> vector<8x1xf32>
    %134 = vector.broadcast %133 : vector<8x1xf32> to vector<8x8xf32>
    %135 = arith.mulf %130, %134 : vector<8x8xf32>
    %136 = arith.truncf %135 : vector<8x8xf32> to vector<8x8xbf16>
    %c3_93 = arith.constant 3 : index
    %c0_94 = arith.constant 0 : index
    %c0_95 = arith.constant 0 : index
    %137 = vector.load %arg15[%c3_93, %c0_94, %c0_95] : memref<4x8x8xbf16, #tpu.memory_space<vmem>>, vector<1x8x8xbf16>
    %138 = vector.shape_cast %137 : vector<1x8x8xbf16> to vector<8x8xbf16>
    %cst_96 = arith.constant dense<0.000000e+00> : vector<8x8xf32>
    %139 = tpu.matmul %136, %138, %cst_96 {dimension_numbers = #tpu.dot_dimension_numbers<[1], [0], [0], [1], [0, 0, 1, 1], [], []>} : vector<8x8xbf16>, vector<8x8xbf16>, vector<8x8xf32> -> vector<8x8xf32>
    %c0_97 = arith.constant 0 : index
    %c0_98 = arith.constant 0 : index
    %140 = vector.load %arg16[%c0_97, %c0_98] : memref<8x32xf32, #tpu.memory_space<vmem>>, vector<8x32xf32>
    %141 = arith.truncf %139 : vector<8x8xf32> to vector<8x8xbf16>
    %c3_99 = arith.constant 3 : index
    %c0_100 = arith.constant 0 : index
    %c0_101 = arith.constant 0 : index
    %142 = vector.load %arg9[%c3_99, %c0_100, %c0_101] : memref<4x8x32xbf16, #tpu.memory_space<vmem>>, vector<1x8x32xbf16>
    %143 = vector.shape_cast %142 : vector<1x8x32xbf16> to vector<8x32xbf16>
    %cst_102 = arith.constant dense<0.000000e+00> : vector<8x32xf32>
    %144 = tpu.matmul %141, %143, %cst_102 {dimension_numbers = #tpu.dot_dimension_numbers<[1], [0], [0], [1], [0, 0, 1, 1], [], []>} : vector<8x8xbf16>, vector<8x32xbf16>, vector<8x32xf32> -> vector<8x32xf32>
    %145 = arith.addf %140, %144 : vector<8x32xf32>
    %c0_103 = arith.constant 0 : index
    %c0_104 = arith.constant 0 : index
    %146 = vector.load %arg16[%c0_103, %c0_104] : memref<8x32xf32, #tpu.memory_space<vmem>>, vector<8x32xf32>
    tpu.vector_store %arg16[%c0_103, %c0_104], %145 {strides = array<i32>} : memref<8x32xf32, #tpu.memory_space<vmem>>, vector<8x32xf32>,
    %c0_105 = arith.constant 0 : index
    %c0_106 = arith.constant 0 : index
    %147 = vector.load %arg16[%c0_105, %c0_106] : memref<8x32xf32, #tpu.memory_space<vmem>>, vector<8x32xf32>
    %c0_107 = arith.constant 0 : index
    %c0_108 = arith.constant 0 : index
    %148 = vector.load %arg10[%c0_107, %c0_108] : memref<1x32xf32, #tpu.memory_space<vmem>>, vector<1x32xf32>
    %149 = vector.broadcast %148 : vector<1x32xf32> to vector<8x32xf32>
    %150 = arith.addf %147, %149 : vector<8x32xf32>
    %151 = arith.addf %150, %7 : vector<8x32xf32>
    %c0_109 = arith.constant 0 : index
    %c0_110 = arith.constant 0 : index
    %152 = vector.load %arg11[%c0_109, %c0_110] : memref<1x32xf32, #tpu.memory_space<vmem>>, vector<1x32xf32>
    %c0_111 = arith.constant 0 : index
    %c0_112 = arith.constant 0 : index
    %153 = vector.load %arg12[%c0_111, %c0_112] : memref<1x32xf32, #tpu.memory_space<vmem>>, vector<1x32xf32>
    %cst_113 = arith.constant dense<0.000000e+00> : vector<8xf32>
    %154 = vector.multi_reduction <add>, %151, %cst_113 [1] : vector<8x32xf32> to vector<8xf32>
    %155 = vector.shape_cast %154 : vector<8xf32> to vector<8x1xf32>
    %cst_114 = arith.constant 3.200000e+01 : f32
    %156 = vector.broadcast %cst_114 : f32 to vector<8x1xf32>
    %157 = arith.divf %155, %156 : vector<8x1xf32>
    %158 = vector.broadcast %157 : vector<8x1xf32> to vector<8x32xf32>
    %159 = arith.subf %151, %158 : vector<8x32xf32>
    %160 = arith.mulf %159, %159 : vector<8x32xf32>
    %cst_115 = arith.constant dense<0.000000e+00> : vector<8xf32>
    %161 = vector.multi_reduction <add>, %160, %cst_115 [1] : vector<8x32xf32> to vector<8xf32>
    %162 = vector.shape_cast %161 : vector<8xf32> to vector<8x1xf32>
    %cst_116 = arith.constant 3.200000e+01 : f32
    %163 = vector.broadcast %cst_116 : f32 to vector<8x1xf32>
    %164 = arith.divf %162, %163 : vector<8x1xf32>
    %165 = vector.broadcast %157 : vector<8x1xf32> to vector<8x32xf32>
    %166 = arith.subf %151, %165 : vector<8x32xf32>
    %cst_117 = arith.constant 9.99999997E-7 : f32
    %167 = vector.broadcast %cst_117 : f32 to vector<8x1xf32>
    %168 = arith.addf %164, %167 : vector<8x1xf32>
    %169 = math.rsqrt %168 : vector<8x1xf32>
    %170 = vector.broadcast %169 : vector<8x1xf32> to vector<8x32xf32>
    %171 = arith.mulf %166, %170 : vector<8x32xf32>
    %172 = vector.broadcast %152 : vector<1x32xf32> to vector<8x32xf32>
    %173 = arith.mulf %171, %172 : vector<8x32xf32>
    %174 = vector.broadcast %153 : vector<1x32xf32> to vector<8x32xf32>
    %175 = arith.addf %173, %174 : vector<8x32xf32>
    %c0_118 = arith.constant 0 : index
    %c0_119 = arith.constant 0 : index
    %c0_120 = arith.constant 0 : index
    %176 = vector.load %arg13[%c0_118, %c0_119, %c0_120] : memref<1x8x32xf32, #tpu.memory_space<vmem>>, vector<1x8x32xf32>
    %177 = vector.shape_cast %176 : vector<1x8x32xf32> to vector<8x32xf32>
    %178 = vector.shape_cast %175 : vector<8x32xf32> to vector<1x8x32xf32>
    tpu.vector_store %arg13[%c0_118, %c0_119, %c0_120], %178 {strides = array<i32>} : memref<1x8x32xf32, #tpu.memory_space<vmem>>, vector<1x8x32xf32>,
    return
  }
  func.func @transform_0(%arg0: i32, %arg1: i32) -> (i32, i32, i32) {
    %c0_i32 = arith.constant 0 : i32
    %c0_i32_0 = arith.constant 0 : i32
    %c0_i32_1 = arith.constant 0 : i32
    return %arg0, %c0_i32, %c0_i32_0 : i32, i32, i32
  }
  func.func @transform_1(%arg0: i32, %arg1: i32) -> (i32, i32, i32) {
    %c0_i32 = arith.constant 0 : i32
    %c0_i32_0 = arith.constant 0 : i32
    %c0_i32_1 = arith.constant 0 : i32
    %c0_i32_2 = arith.constant 0 : i32
    return %c0_i32, %c0_i32_0, %c0_i32_1 : i32, i32, i32
  }
  func.func @transform_2(%arg0: i32, %arg1: i32) -> (i32, i32, i32) {
    %c0_i32 = arith.constant 0 : i32
    %c0_i32_0 = arith.constant 0 : i32
    %c0_i32_1 = arith.constant 0 : i32
    %c0_i32_2 = arith.constant 0 : i32
    return %c0_i32, %c0_i32_0, %c0_i32_1 : i32, i32, i32
  }
  func.func @transform_3(%arg0: i32, %arg1: i32) -> (i32, i32, i32) {
    %c0_i32 = arith.constant 0 : i32
    %c0_i32_0 = arith.constant 0 : i32
    %c0_i32_1 = arith.constant 0 : i32
    %c0_i32_2 = arith.constant 0 : i32
    return %c0_i32, %c0_i32_0, %c0_i32_1 : i32, i32, i32
  }
  func.func @transform_4(%arg0: i32, %arg1: i32) -> (i32, i32, i32) {
    %c0_i32 = arith.constant 0 : i32
    %c0_i32_0 = arith.constant 0 : i32
    %c0_i32_1 = arith.constant 0 : i32
    %c0_i32_2 = arith.constant 0 : i32
    return %c0_i32, %c0_i32_0, %c0_i32_1 : i32, i32, i32
  }
  func.func @transform_5(%arg0: i32, %arg1: i32) -> (i32, i32, i32) {
    %c0_i32 = arith.constant 0 : i32
    %c0_i32_0 = arith.constant 0 : i32
    %c0_i32_1 = arith.constant 0 : i32
    %c0_i32_2 = arith.constant 0 : i32
    return %c0_i32, %c0_i32_0, %c0_i32_1 : i32, i32, i32
  }
  func.func @transform_6(%arg0: i32, %arg1: i32) -> (i32, i32, i32) {
    %c0_i32 = arith.constant 0 : i32
    %c0_i32_0 = arith.constant 0 : i32
    %c0_i32_1 = arith.constant 0 : i32
    %c0_i32_2 = arith.constant 0 : i32
    return %c0_i32, %c0_i32_0, %c0_i32_1 : i32, i32, i32
  }
  func.func @transform_7(%arg0: i32, %arg1: i32) -> (i32, i32, i32) {
    %c0_i32 = arith.constant 0 : i32
    %c0_i32_0 = arith.constant 0 : i32
    %c0_i32_1 = arith.constant 0 : i32
    %c0_i32_2 = arith.constant 0 : i32
    return %c0_i32, %c0_i32_0, %c0_i32_1 : i32, i32, i32
  }
  func.func @transform_8(%arg0: i32, %arg1: i32) -> (i32, i32) {
    %c0_i32 = arith.constant 0 : i32
    %c0_i32_0 = arith.constant 0 : i32
    %c0_i32_1 = arith.constant 0 : i32
    return %c0_i32, %c0_i32_0 : i32, i32
  }
  func.func @transform_9(%arg0: i32, %arg1: i32) -> (i32, i32) {
    %c0_i32 = arith.constant 0 : i32
    %c0_i32_0 = arith.constant 0 : i32
    %c0_i32_1 = arith.constant 0 : i32
    return %c0_i32, %c0_i32_0 : i32, i32
  }
  func.func @transform_10(%arg0: i32, %arg1: i32) -> (i32, i32) {
    %c0_i32 = arith.constant 0 : i32
    %c0_i32_0 = arith.constant 0 : i32
    %c0_i32_1 = arith.constant 0 : i32
    return %c0_i32, %c0_i32_0 : i32, i32
  }
  func.func @transform_11(%arg0: i32, %arg1: i32) -> (i32, i32, i32) {
    %c0_i32 = arith.constant 0 : i32
    %c0_i32_0 = arith.constant 0 : i32
    return %arg0, %arg1, %c0_i32 : i32, i32, i32
  }
}

</mosaic_0001>

<bundles_post_ra>
// kernel: tpu_custom_call.1
= control target key start
LH: loop header
LB: loop body
LE: loop exit
PB: predicated region body
PF: predicated region fallthrough
CT: control target
= control target key end

     0   :  { %16 = vsyncpa [#allocation6], 0  ;;  %s2052_s0 = inlined_call_operand.vmem [shape: f32[2,8,32], index: 0, kind: input, shape index: {}]   ;;  %s2053_s1 = inlined_call_operand.vmem [shape: bf16[4,32,8], index: 1, kind: input, shape index: {}]   ;;  %s2054_s2 = inlined_call_operand.vmem [shape: f32[4,1,8], index: 2, kind: input, shape index: {}]   ;;  %s2055_s3 = inlined_call_operand.vmem [shape: bf16[4,32,8], index: 3, kind: input, shape index: {}]   ;;  %s2056_s4 = inlined_call_operand.vmem [shape: f32[4,1,8], index: 4, kind: input, shape index: {}]   ;;  %s2057_s5 = inlined_call_operand.vmem [shape: bf16[4,32,8], index: 5, kind: input, shape index: {}]   ;;  %s2058_s6 = inlined_call_operand.vmem [shape: f32[4,1,8], index: 6, kind: input, shape index: {}]   ;;  %s2059_s7 = inlined_call_operand.vmem [shape: bf16[4,8,32], index: 7, kind: input, shape index: {}]   ;;  %s2060_s8 = inlined_call_operand.vmem [shape: f32[1,32], index: 8, kind: input, shape index: {}]   ;;  %s2061_s9 = inlined_call_operand.vmem [shape: f32[1,32], index: 9, kind: input, shape index: {}]   ;;  %s2062_s10 = inlined_call_operand.vmem [shape: f32[1,32], index: 10, kind: input, shape index: {}]   ;;  %s2063_s11 = inlined_call_operand.hbm [shape: f32[2,8,32], index: 11, kind: output, shape index: {}]  }
   0x1   :  { %18 = vsyncpa [#allocation6 + $0x1], 0  ;;  %s1747_s17 = smov 0   ;;  %s1749_s18 = smov 0  }
   0x2   :  { %s1751_s19 = smov 0   ;;  %s1753_s20 = smov 0  }
   0x3   :  { %s1755_s21 = smov 0   ;;  %s1757_s22 = smov 0  }
   0x4 LB: > { %2067 = sst [smem:[#allocation8_spill]] %s1671_s19  ;;  %s1310_s23 = sadd.s32 4294967295, %s1683_s22   ;;  %s1683_s22 = sphi %s1757_s22, %s24_s22   ;;  %s1679_s21 = sphi %s1755_s21, %s2076_s21   ;;  %s1675_s20 = sphi %s1753_s20, %s2075_s20   ;;  %s1671_s19 = sphi %s1751_s19, %s2074_s19   ;;  %s1667_s18 = sphi %s1749_s18, %s2078_s18   ;;  %s1663_s17 = sphi %s1747_s17, %s2077_s17  }
   0x5   : > { %2068 = sst [smem:[#allocation9_spill]] %s1679_s21  ;;  %s1311_s24 = sadd.s32 4294967294, %s1683_s22  }
   0x6   : > { %s36_s25 = sadd.s32 1, %s1679_s21  ;;  %s281_s26 = sadd.s32 1, %s1671_s19 }
   0x7   : > { %p38_p0 = scmp.ge.s32.totalorder %s36_s25, 2  ;;  %p291_p1 = scmp.ne.s32.totalorder %s1671_s19, %s1667_s18 }
   0x8   : > { %p292_p2 = scmp.eq.s32.totalorder %s1310_s23, 1  ;;  %p297_p3 = scmp.ne.s32.totalorder %s1667_s18, %s1663_s17 }
   0x9   : > { %s2080_s25 = smov (%p38_p0, %s36_s25), 0  ;;  %p298_p5 = scmp.eq.s32.totalorder %s1311_s24, 1 }
   0xa   : > { %2069 = sst [smem:[#allocation10_spill]] %s2080_s25  ;;  %p1787_p4 = por %p292_p2, %p291_p1 }
   0xb   : > { %s276_s28 = ssub.s32 %s1679_s21, %s2080_s25  ;;  %p1314_p6 = scmp.ge.s32.totalorder %s1683_s22, 1 }
   0xc   : > { %p279_p7 = scmp.eq.s32.totalorder %s276_s28, 0  ;;  %p1794_p8 = por %p298_p5, %p297_p3 }
   0xd   : > { %p353_p9 = scmp.lt.s32.totalorder %s1683_s22, 3 }
   0xe   : > { %s1800_s30 = scalar_select %p279_p7, %s1671_s19, %s281_s26  }
   0xf   : > { %p354_p10 = pnand %p1314_p6, %p353_p9 }
  0x10   : > { %2072 = sst [smem:[#allocation11_spill]] %s1800_s30  ;;  %p392_p11 = scmp.lt.s32.totalorder (!%p354_p10), %s1675_s20, 1 }
  0x11   : > { %357 = sbr.rel (%p354_p10) target bundleno = 1175 (0x497), region = 64  ;;  %s389_s23 = sand.u32 (!%p354_p10), 1, %s1667_s18  }
  0x12   : > { %s1486_s26 = sshll.u32 (!%p354_p10), %s1675_s20, 3  ;;  %s1224_s30 = scalar_lea.sflag (!%p354_p10), [#allocation6], %s389_s23 }
  0x13   : > { %s1235_s15 = scalar_lea.hbm (!%p354_p10), %s2063_s11, %s1486_s26 }
  0x14   : > { %s1239_s19 = sshll.u32 (!%p354_p10), %s1235_s15, 4  ;;  %s1240_s19 = int_to_ptr.hbm [resolvable:$true] %s1239_s19 }
  0x15   : > { %s1619_s28 = sshra.s32 (!%p354_p10), %s1240_s19, 4  ;;  %s1620_s28 = int_to_ptr.hbm [resolvable:$true] %s1619_s28 }
  0x16   : > { %v1490_v0 = vld [vmem:[%s2055_s3 + $0x8] sm:$0xff]  ;;  %v1489_v1 = vld [vmem:[%s2055_s3] sm:$0xff]  ;;  %v1494_v2 = vld [vmem:[%s2055_s3 + $0x18] sm:$0xff]  ;;  %s393_s24 = scalar_select %p392_p11, %s1675_s20, 1  ;;  %vm423_vm0 = vcmask 261120   ;;  %vm474_vm1 = vcmask 60416  }
  0x17   : > { %433 = vmatpush.bf16.msra.mxu0 %v1490_v0  ;;  %v1498_v3 = vld [vmem:[%s2055_s3 + $0x28] sm:$0xff]  ;;  %v1493_v4 = vld [vmem:[%s2055_s3 + $0x10] sm:$0xff]  ;;  %506 = vmatpush.bf16.msra.mxu2 %v1494_v2  ;;  %v1497_v5 = vld [vmem:[%s2055_s3 + $0x20] sm:$0xff]  ;;  %vm750_vm2 = vcmask 64512   ;;  %vm787_vm3 = vcmask 1043456   ;;  %s1621_s26 = scalar_lea.hbm %s1620_s28, 8  ;;  %p1626_p1 = scmp.lt.s32.totalorder %s1620_s28, %s2063_s11 }
  0x18   : > { %s1316_s13 = sshll.u32 %s393_s24, 3  ;;  %v1506_v8 = vld [vmem:[%s2053_s1 + $0x8] sm:$0xff]  ;;  %v1502_v9 = vld [vmem:[%s2055_s3 + $0x38] sm:$0xff]  ;;  %v1501_v10 = vld [vmem:[%s2055_s3 + $0x30] sm:$0xff]  ;;  %s1315_s24 = sshll.u32 %s389_s23, 3 }
  0x19   : > { %s395_s14 = scalar_lea.vmem %s2052_s0, %s1316_s13  ;;  %v1505_v11 = vld [vmem:[%s2053_s1] sm:$0xff]  ;;  %v1508_v12 = vld [vmem:[%s2053_s1 + $0x18] sm:$0xff]  ;;  %v1507_v13 = vld [vmem:[%s2053_s1 + $0x10] sm:$0xff]  ;;  %s391_s21 = scalar_lea.vmem [#allocation5], %s1315_s24 }
  0x1a   : > { %v1825_v6 = vld [vmem:[%s395_s14] sm:$0xff]  ;;  %v1510_v14 = vld [vmem:[%s2053_s1 + $0x28] sm:$0xff]  ;;  %v1512_v16 = vld [vmem:[%s2053_s1 + $0x38] sm:$0xff]  ;;  %s1237_s20 = sshll.u32 %s391_s21, 4  ;;  %p1622_p12 = scmp.ne.s32.totalorder %s1620_s28, %s1621_s26  ;;  %s1238_s20 = int_to_ptr.vmem [resolvable:$true] %s1237_s20 }
  0x1b   : > { %434 = vmatpush.bf16.msra.mxu0 %v1489_v1  ;;  %v1829_v7 = vpack.c.bf16 %v1825_v6, %v1825_v6  ;;  %507 = vmatpush.bf16.msra.mxu2 %v1493_v4  ;;  %v1509_v15 = vld [vmem:[%s2053_s1 + $0x20] sm:$0xff]  ;;  %v1492_v17 = vld [vmem:[%s2057_s5 + $0x8] sm:$0xff]  ;;  %v1511_v18 = vld [vmem:[%s2053_s1 + $0x30] sm:$0xff]  ;;  %s1625_s24 = scalar_lea.hbm %s2063_s11, 16 }
  0x1c   : > { %466 = vmatpush.bf16.msra.mxu1 %v1492_v17  ;;  %v1491_v19 = vld [vmem:[%s2057_s5] sm:$0xff]  ;;  %v1500_v20 = vld [vmem:[%s2057_s5 + $0x28] sm:$0xff]  ;;  %p1623_p13 = pnand %p1622_p12, %p1787_p4  ;;  %p1627_p2 = scmp.lt.s32.totalorder %s1625_s24, %s1621_s26 }
  0x1d   : > { %v1499_v21 = vld [vmem:[%s2057_s5 + $0x20] sm:$0xff] }
  0x1e   : > { %1325 = vmatmul.msk.bf16.vlgmr.msra.gmra.mxu0 %vm423_vm0, %v1829_v7  ;;  %1348 = vmatmul.msk.bf16.vlgmr.msra.gmra.mxu2 %vm423_vm0, %v1829_v7  ;;  %v1570_v22 = vld [vmem:[%s2056_s4] ss:$0 sm:$0xff]  ;;  %v1571_v26 = vld [vmem:[%s2056_s4 + $0x1] ss:$0 sm:$0xff]  ;;  %v1572_v33 = vld [vmem:[%s2056_s4 + $0x2] ss:$0 sm:$0xff]  ;;  %p1624_p0 = pneg %p1623_p13  ;;  %p1628_p3 = por %p1627_p2, %p1626_p1 }
  0x1f   : > { %582 = vmatpush.bf16.msrb.mxu0 %v1498_v3  ;;  %658 = vmatpush.bf16.msrb.mxu2 %v1502_v9  ;;  %v1574_v40 = vld [vmem:[%s2056_s4 + $0x3] ss:$0 sm:$0xff]  ;;  %v1573_v45 = vld [vmem:[%s2054_s2] ss:$0 sm:$0xff]  ;;  %v1575_v53 = vld [vmem:[%s2054_s2 + $0x1] ss:$0 sm:$0xff] }
  0x20   : > { %467 = vmatpush.bf16.msra.mxu1 %v1491_v19  ;;  %v1578_v60 = vld [vmem:[%s2058_s6] ss:$0 sm:$0xff]  ;;  %v1576_v0 = vld [vmem:[%s2054_s2 + $0x2] ss:$0 sm:$0xff]  ;;  %p1629_p5 = pnand %p1628_p3, %p1624_p0 }
  0x23   : > { %583 = vmatpush.bf16.msrb.mxu0 %v1497_v5  ;;  %659 = vmatpush.bf16.msrb.mxu2 %v1501_v10 }
  0x24   : > { %1334 = vmatmul.msk.bf16.vlgmr.msra.gmra.mxu1 %vm423_vm0, %v1829_v7 }
  0x25   : > { %617 = vmatpush.bf16.msrb.mxu1 %v1500_v20 }
  0x27   : > { %741 = vmatpush.bf16.msra.mxu0 %v1506_v8  ;;  %v1577_v8 = vld [vmem:[%s2054_s2 + $0x3] ss:$0 sm:$0xff] }
  0x29   : > { %618 = vmatpush.bf16.msrb.mxu1 %v1499_v21 }
  0x2b   : > { %742 = vmatpush.bf16.msra.mxu0 %v1505_v11 }
  0x2e   : > { %1376 = vmatmul.msk.bf16.vlgmr.msrb.gmra.mxu0 %vm423_vm0, %v1829_v7  ;;  %1404 = vmatmul.msk.bf16.vlgmr.msrb.gmra.mxu2 %vm423_vm0, %v1829_v7 }
  0x2f   : > { %856 = vmatpush.bf16.msrb.mxu0 %v1508_v12 }
  0x33   : > { %857 = vmatpush.bf16.msrb.mxu0 %v1507_v13 }
  0x34   : > { %1390 = vmatmul.msk.bf16.vlgmr.msrb.gmra.mxu1 %vm423_vm0, %v1829_v7 }
  0x3e   : > { %1427 = vmatmul.msk.bf16.vlgmr.msra.gmra.mxu0 %vm423_vm0, %v1829_v7 }
  0x3f   : > { %972 = vmatpush.bf16.msra.mxu0 %v1510_v14 }
  0x43   : > { %973 = vmatpush.bf16.msra.mxu0 %v1509_v15  ;;  %v1579_v15 = vld [vmem:[%s2058_s6 + $0x2] ss:$0 sm:$0xff] }
  0x4e   : > { %1444 = vmatmul.msk.bf16.vlgmr.msrb.gmra.mxu0 %vm423_vm0, %v1829_v7 }
  0x4f   : > { %1088 = vmatpush.bf16.msrb.mxu0 %v1512_v16 }
  0x53   : > { %1089 = vmatpush.bf16.msrb.mxu0 %v1511_v18 }
  0x5e   : > { %1462 = vmatmul.msk.bf16.vlgmr.msra.gmra.mxu0 %vm423_vm0, %v1829_v7 }
  0x6e   : > { %1480 = vmatmul.msk.bf16.vlgmr.msrb.gmra.mxu0 %vm423_vm0, %v1829_v7 }
  0x9b   : > { %v436_v23 = vpop.f32.mrf.mxu0 }
  0x9c   : > { %v437_v24 = vadd.f32 %v1570_v22, %v436_v23 }
  0x9e   : > { %v473_v25 = vpack.c.bf16 %v437_v24, %v437_v24 }
  0xa0   : > { %475 = vst.msk [vmem:[#allocation2] sm:$0xf] %vm474_vm1, %v473_v25 }
  0xa1   : > { %v509_v27 = vpop.f32.mrf.mxu2  ;;  %v469_v61 = vpop.f32.mrf.mxu1 }
  0xa2   : > { %v510_v29 = vadd.f32 %v1571_v26, %v509_v27  ;;  %v470_v62 = vadd.f32 %v1578_v60, %v469_v61 }
  0xa3   : > { %v438_v28 = vpop.f32.mrf.mxu0 }
  0xa4   : > { %v548_v30 = vpack.c.bf16 %v510_v29, %v510_v29  ;;  %v476_v63 = vpack.c.bf16 %v470_v62, %v470_v62  ;;  %v1496_v28 = vld [vmem:[%s2057_s5 + $0x18] sm:$0xff]  ;;  %v1495_v29 = vld [vmem:[%s2057_s5 + $0x10] sm:$0xff] }
  0xa5   : > { %541 = vmatpush.bf16.msra.mxu3 %v1496_v28 }
  0xa6   : > { %550 = vst.msk [vmem:[#allocation2 + $0x4] sm:$0xf] %vm474_vm1, %v548_v30 }
  0xa7   : > { %v749_v31 = vld [vmem:[#allocation2] sm:$0xf]  ;;  %477 = vst.msk [vmem:[#allocation3] sm:$0xf] %vm474_vm1, %v476_v63 }
  0xa8   : > { %v755_v32 = vsel %vm750_vm2, %v749_v31, 0 }
  0xa9   : > { %764 = vmatpush.bf16.xpose.msra.mxu1 %v755_v32  ;;  %v511_v34 = vpop.f32.mrf.mxu2  ;;  %v471_v3 = vpop.f32.mrf.mxu1  ;;  %542 = vmatpush.bf16.msra.mxu3 %v1495_v29 }
  0xab   : > { %v585_v35 = vpop.f32.mrf.mxu0 }
  0xac   : > { %v586_v36 = vadd.f32 %v1572_v33, %v585_v35  ;;  %1362 = vmatmul.msk.bf16.vlgmr.msra.gmra.mxu3 %vm423_vm0, %v1829_v7 }
  0xad   : > { %v865_v38 = vld [vmem:[#allocation2 + $0x4] sm:$0xf] }
  0xae   : > { %v624_v37 = vpack.c.bf16 %v586_v36, %v586_v36  ;;  %v870_v39 = vsel %vm750_vm2, %v865_v38, 0  ;;  %v783_v9 = vld [vmem:[#allocation3] sm:$0xf]  ;;  %v1504_v38 = vld [vmem:[%s2057_s5 + $0x38] sm:$0xff] }
  0xaf   : > { %v789_v11 = vsel %vm787_vm3, %v783_v9, 0  ;;  %693 = vmatpush.bf16.msrb.mxu3 %v1504_v38  ;;  %v1483_v38 = vld [vmem:[%s2059_s7 + $0xc] sm:$0xf] }
  0xb0   : > { %626 = vst.msk [vmem:[#allocation2 + $0x8] sm:$0xf] %vm474_vm1, %v624_v37  ;;  %798 = vmatpush.bf16.msra.mxu2 %v789_v11 }
  0xb1   : > { %879 = vmatpush.bf16.xpose.msrb.mxu1 %v870_v39  ;;  %v661_v41 = vpop.f32.mrf.mxu2  ;;  %v620_v16 = vpop.f32.mrf.mxu1  ;;  %v1503_v39 = vld [vmem:[%s2057_s5 + $0x30] sm:$0xff] }
  0xb2   : > { %v662_v43 = vadd.f32 %v1574_v40, %v661_v41  ;;  %v621_v17 = vadd.f32 %v1579_v15, %v620_v16 }
  0xb3   : > { %v587_v42 = vpop.f32.mrf.mxu0  ;;  %694 = vmatpush.bf16.msrb.mxu3 %v1503_v39 }
  0xb4   : > { %v700_v44 = vpack.c.bf16 %v662_v43, %v662_v43  ;;  %v627_v18 = vpack.c.bf16 %v621_v17, %v621_v17 }
  0xb6   : > { %702 = vst.msk [vmem:[#allocation2 + $0xc] sm:$0xf] %vm474_vm1, %v700_v44 }
  0xb7   : > { %v981_v49 = vld [vmem:[#allocation2 + $0x8] sm:$0xf]  ;;  %629 = vst.msk [vmem:[#allocation3 + $0x8] sm:$0xf] %vm474_vm1, %v627_v18 }
  0xb8   : > { %v986_v51 = vsel %vm750_vm2, %v981_v49, 0 }
  0xb9   : > { %v663_v46 = vpop.f32.mrf.mxu2  ;;  %v622_v19 = vpop.f32.mrf.mxu1 }
  0xbb   : > { %v744_v47 = vpop.f32.mrf.mxu0 }
  0xbc   : > { %v745_v48 = vadd.f32 %v1573_v45, %v744_v47  ;;  %1418 = vmatmul.msk.bf16.vlgmr.msrb.gmra.mxu3 %vm423_vm0, %v1829_v7  ;;  %v1580_v7 = vld [vmem:[%s2058_s6 + $0x1] ss:$0 sm:$0xff] }
  0xbd   : > { %v1097_v55 = vld [vmem:[#allocation2 + $0xc] sm:$0xf] }
  0xbe   : > { %v748_v50 = vpack.c.bf16 %v745_v48, %v745_v48  ;;  %v1102_v58 = vsel %vm750_vm2, %v1097_v55, 0 }
  0xc0   : > { %1428 = vmatmul.msk.bf16.vlgmr.msra.gmra.mxu1 %vm750_vm2, %v748_v50 }
  0xc1   : > { %995 = vmatpush.bf16.xpose.msra.mxu1 %v986_v51 }
  0xc3   : > { %v746_v52 = vpop.f32.mrf.mxu0 }
  0xcb   : > { %v859_v54 = vpop.f32.mrf.mxu0 }
  0xcc   : > { %v860_v56 = vadd.f32 %v1575_v53, %v859_v54 }
  0xce   : > { %v863_v57 = vpack.c.bf16 %v860_v56, %v860_v56 }
  0xd0   : > { %1445 = vmatmul.msk.bf16.vlgmr.msrb.gmra.mxu1 %vm750_vm2, %v863_v57 }
  0xd1   : > { %1111 = vmatpush.bf16.xpose.msrb.mxu1 %v1102_v58 }
  0xd3   : > { %v861_v59 = vpop.f32.mrf.mxu0 }
  0xdb   : > { %v975_v1 = vpop.f32.mrf.mxu0 }
  0xdc   : > { %v976_v2 = vadd.f32 %v1576_v0, %v975_v1 }
  0xde   : > { %v979_v4 = vpack.c.bf16 %v976_v2, %v976_v2  ;;  %v1581_v2 = vld [vmem:[%s2058_s6 + $0x3] ss:$0 sm:$0xff] }
  0xe0   : > { %1463 = vmatmul.msk.bf16.vlgmr.msra.gmra.mxu1 %vm750_vm2, %v979_v4 }
  0xe3   : > { %v977_v5 = vpop.f32.mrf.mxu0 }
  0xeb   : > { %v1091_v10 = vpop.f32.mrf.mxu0 }
  0xec   : > { %v1092_v12 = vadd.f32 %v1577_v8, %v1091_v10 }
  0xee   : > { %v1095_v13 = vpack.c.bf16 %v1092_v12, %v1092_v12  ;;  %v1015_v12 = vld [vmem:[#allocation3 + $0x8] sm:$0xf] }
  0xf0   : > { %1481 = vmatmul.msk.bf16.vlgmr.msrb.gmra.mxu1 %vm750_vm2, %v1095_v13 }
  0xf3   : > { %v1093_v14 = vpop.f32.mrf.mxu0 }
  0xf4   : > { %v1020_v14 = vsel %vm787_vm3, %v1015_v12, 0 }
 0x12f   : > { %v544_v55 = vpop.f32.mrf.mxu3 }
 0x130   : > { %v545_v56 = vadd.f32 %v1580_v7, %v544_v55 }
 0x132   : > { %v551_v58 = vpack.c.bf16 %v545_v56, %v545_v56 }
 0x134   : > { %553 = vst.msk [vmem:[#allocation3 + $0x4] sm:$0xf] %vm474_vm1, %v551_v58 }
 0x137   : > { %v546_v61 = vpop.f32.mrf.mxu3 }
 0x13b   : > { %v899_v0 = vld [vmem:[#allocation3 + $0x4] sm:$0xf] }
 0x13c   : > { %v904_v1 = vsel %vm787_vm3, %v899_v0, 0  ;;  %v1582_v0 = vld [vmem:[%s2060_s8] ss:$0 sm:$0xff] }
 0x13d   : > { %v766_v20 = vpop.f32.mrf.mxu1  ;;  %913 = vmatpush.bf16.msrb.mxu2 %v904_v1 }
 0x13e   : > { %v770_v21 = vmul.f32 0.35355338, %v766_v20 }
 0x13f   : > { %v696_v3 = vpop.f32.mrf.mxu3 }
 0x140   : > { %v771_v22 = vsel %vm750_vm2, %v770_v21, -inf  ;;  %v697_v4 = vadd.f32 %v1581_v2, %v696_v3 }
 0x141   : > { %772 = vmax.xlane.f32.xlu0 %v771_v22 }
 0x142   : > { %v703_v5 = vpack.c.bf16 %v697_v4, %v697_v4 }
 0x144   : > { %705 = vst.msk [vmem:[#allocation3 + $0xc] sm:$0xf] %vm474_vm1, %v703_v5 }
 0x145   : > { %v768_v23 = vpop.f32.mrf.mxu1 }
 0x147   : > { %v698_v9 = vpop.f32.mrf.mxu3 }
 0x14b   : > { %v1131_v17 = vld [vmem:[#allocation3 + $0xc] sm:$0xf] }
 0x14c   : > { %v1136_v20 = vsel %vm787_vm3, %v1131_v17, 0 }
 0x14d   : > { %v881_v24 = vpop.f32.mrf.mxu1 }
 0x14e   : > { %v885_v25 = vmul.f32 0.35355338, %v881_v24 }
 0x150   : > { %v886_v26 = vsel %vm750_vm2, %v885_v25, -inf }
 0x151   : > { %887 = vmax.xlane.f32.xlu0 %v886_v26 }
 0x155   : > { %v883_v27 = vpop.f32.mrf.mxu1 }
 0x15d   : > { %v997_v30 = vpop.f32.mrf.mxu1 }
 0x15e   : > { %v1001_v31 = vmul.f32 0.35355338, %v997_v30 }
 0x160   : > { %v1002_v32 = vsel %vm750_vm2, %v1001_v31, -inf }
 0x161   : > { %1003 = vmax.xlane.f32.xlu1 %v1002_v32 }
 0x165   : > { %v999_v33 = vpop.f32.mrf.mxu1 }
 0x166   : > { %v1465_v33 = vld [vmem:[%s2059_s7 + $0x8] sm:$0xf] }
 0x16d   : > { %v1113_v34 = vpop.f32.mrf.mxu1 }
 0x16e   : > { %v1117_v35 = vmul.f32 0.35355338, %v1113_v34 }
 0x170   : > { %v1118_v36 = vsel %vm750_vm2, %v1117_v35, -inf }
 0x171   : > { %1119 = vmax.xlane.f32.xlu1 %v1118_v36  ;;  %v1043_v36 = vsel %vm787_vm3, %v1465_v33, 0 }
 0x175   : > { %v1115_v37 = vpop.f32.mrf.mxu1 }
 0x1b4   : > { %v773_v40 = vpop.xlane.xlu0 %772 }
 0x1b5   : > { %v774_v41 = vsub.f32 %v770_v21, %v773_v40  ;;  %v806_v21 = vld [vmem:[%s2059_s7] sm:$0xf] }
 0x1b6   : > { %v811_v22 = vsel %vm787_vm3, %v806_v21, 0 }
 0x1b7   : > { %v775_v42 = vmul.f32 1.442695, %v774_v41  ;;  %820 = vmatpush.bf16.msra.mxu3 %v811_v22  ;;  %v1159_v41 = vsel %vm787_vm3, %v1483_v38, 0 }
 0x1b9   : > { %1585 = vpow2.f32 %v775_v42 }
 0x1bf   : > { %v1586_v43 = vpop.eup %1585 }
 0x1c0   : > { %v777_v44 = vsel %vm750_vm2, %v1586_v43, 0.0 }
 0x1c1   : > { %778 = vadd.xlane.f32.xlu2 %v777_v44 }
 0x1c4   : > { %v888_v45 = vpop.xlane.xlu0 %887 }
 0x1c5   : > { %v889_v46 = vsub.f32 %v885_v25, %v888_v45 }
 0x1c7   : > { %v890_v47 = vmul.f32 1.442695, %v889_v46 }
 0x1c9   : > { %1587 = vpow2.f32 %v890_v47 }
 0x1cf   : > { %v1588_v48 = vpop.eup %1587 }
 0x1d0   : > { %v892_v49 = vsel %vm750_vm2, %v1588_v48, 0.0 }
 0x1d1   : > { %893 = vadd.xlane.f32.xlu2 %v892_v49 }
 0x1d4   : > { %v1004_v50 = vpop.xlane.xlu1 %1003 }
 0x1d5   : > { %v1005_v51 = vsub.f32 %v1001_v31, %v1004_v50  ;;  %v1447_v31 = vld [vmem:[%s2059_s7 + $0x4] sm:$0xf] }
 0x1d6   : > { %v927_v32 = vsel %vm787_vm3, %v1447_v31, 0  ;;  %v1584_v31 = vld [vmem:[%s2062_s10] ss:$0 sm:$0xff] }
 0x1d7   : > { %v1006_v52 = vmul.f32 1.442695, %v1005_v51  ;;  %936 = vmatpush.bf16.msrb.mxu3 %v927_v32 }
 0x1d9   : > { %1589 = vpow2.f32 %v1006_v52 }
 0x1df   : > { %v1590_v53 = vpop.eup %1589 }
 0x1e0   : > { %v1008_v54 = vsel %vm750_vm2, %v1590_v53, 0.0 }
 0x1e1   : > { %1009 = vadd.xlane.f32.xlu0 %v1008_v54 }
 0x1e4   : > { %v1120_v57 = vpop.xlane.xlu1 %1119 }
 0x1e5   : > { %v1121_v59 = vsub.f32 %v1117_v35, %v1120_v57 }
 0x1e7   : > { %v1122_v60 = vmul.f32 1.442695, %v1121_v59 }
 0x1e9   : > { %1591 = vpow2.f32 %v1122_v60 }
 0x1ef   : > { %v1592_v62 = vpop.eup %1591 }
 0x1f0   : > { %v1124_v63 = vsel %vm750_vm2, %v1592_v62, 0.0 }
 0x1f1   : > { %1125 = vadd.xlane.f32.xlu1 %v1124_v63 }
 0x234   : > { %v779_v8 = vpop.xlane.xlu2 %778 }
 0x235   : > { %1593 = vrcp.f32 %v779_v8  ;;  %v1686_v8 = vmov 32.0  }
 0x23b   : > { %v1594_v10 = vpop.eup %1593 }
 0x23c   : > { %v781_v11 = vmul.f32 %v1594_v10, %v1586_v43  ;;  %v1685_v43 = vmov 0.0  }
 0x23d   : > { %711 = vst.msk [vmem:[#allocation4] sm:$0xff] %vm423_vm0, %v1685_v43 }
 0x23e   : > { %v782_v13 = vpack.c.bf16 %v781_v11, %v781_v11 }
 0x240   : > { %1429 = vmatmul.msk.bf16.vlgmr.msra.gmra.mxu2 %vm750_vm2, %v782_v13 }
 0x241   : > { %1029 = vmatpush.bf16.msra.mxu2 %v1020_v14 }
 0x244   : > { %v894_v15 = vpop.xlane.xlu2 %893  ;;  %v804_v50 = vld [vmem:[#allocation4] sm:$0xff] }
 0x245   : > { %1595 = vrcp.f32 %v894_v15 }
 0x24b   : > { %v1596_v16 = vpop.eup %1595 }
 0x24c   : > { %v896_v18 = vmul.f32 %v1596_v16, %v1588_v48 }
 0x24e   : > { %v897_v19 = vpack.c.bf16 %v896_v18, %v896_v18 }
 0x250   : > { %1446 = vmatmul.msk.bf16.vlgmr.msrb.gmra.mxu2 %vm750_vm2, %v897_v19 }
 0x251   : > { %1145 = vmatpush.bf16.msrb.mxu2 %v1136_v20 }
 0x254   : > { %v1010_v23 = vpop.xlane.xlu0 %1009 }
 0x255   : > { %1597 = vrcp.f32 %v1010_v23 }
 0x25b   : > { %v1598_v24 = vpop.eup %1597 }
 0x25c   : > { %v1012_v25 = vmul.f32 %v1598_v24, %v1590_v53 }
 0x25e   : > { %v1013_v26 = vpack.c.bf16 %v1012_v25, %v1012_v25 }
 0x260   : > { %1464 = vmatmul.msk.bf16.vlgmr.msra.gmra.mxu2 %vm750_vm2, %v1013_v26 }
 0x264   : > { %v1126_v27 = vpop.xlane.xlu1 %1125 }
 0x265   : > { %1599 = vrcp.f32 %v1126_v27 }
 0x266   : > { %1601 = vrcp.f32 %v1686_v8 }
 0x26b   : > { %v1600_v28 = vpop.eup %1599 }
 0x26c   : > { %v1128_v29 = vmul.f32 %v1600_v28, %v1592_v62  ;;  %v1602_v9 = vpop.eup %1601  ;;  %v1583_v28 = vld [vmem:[%s2061_s9] ss:$0 sm:$0xff] }
 0x26d   : > { %v1189_v10 = vmul.f32 32.0, %v1602_v9  ;;  %vm1193_vm4 = vweird.f32 %v1602_v9 }
 0x26e   : > { %v1129_v30 = vpack.c.bf16 %v1128_v29, %v1128_v29 }
 0x26f   : > { %v1190_v11 = vsub.f32 1.0, %v1189_v10 }
 0x270   : > { %1482 = vmatmul.msk.bf16.vlgmr.msrb.gmra.mxu2 %vm750_vm2, %v1129_v30 }
 0x271   : > { %v1191_v12 = vmul.f32 %v1602_v9, %v1190_v11 }
 0x273   : > { %v1192_v13 = vadd.f32 %v1602_v9, %v1191_v12 }
 0x275   : > { %v1194_v14 = vsel %vm1193_vm4, %v1602_v9, %v1192_v13 }
 0x2c3   : > { %v800_v34 = vpop.f32.mrf.mxu2 }
 0x2c4   : > { %v805_v35 = vpack.c.bf16 %v800_v34, %v800_v34 }
 0x2c6   : > { %1430 = vmatmul.msk.bf16.vlgmr.msra.gmra.mxu3 %vm750_vm2, %v805_v35 }
 0x2c7   : > { %1052 = vmatpush.bf16.msra.mxu3 %v1043_v36 }
 0x2cb   : > { %v802_v37 = vpop.f32.mrf.mxu2 }
 0x2d3   : > { %v915_v39 = vpop.f32.mrf.mxu2 }
 0x2d4   : > { %v920_v40 = vpack.c.bf16 %v915_v39, %v915_v39 }
 0x2d6   : > { %1448 = vmatmul.msk.bf16.vlgmr.msrb.gmra.mxu3 %vm750_vm2, %v920_v40 }
 0x2d7   : > { %1168 = vmatpush.bf16.msrb.mxu3 %v1159_v41 }
 0x2db   : > { %v917_v42 = vpop.f32.mrf.mxu2 }
 0x2e3   : > { %v1031_v44 = vpop.f32.mrf.mxu2 }
 0x2e4   : > { %v1036_v45 = vpack.c.bf16 %v1031_v44, %v1031_v44 }
 0x2e6   : > { %1466 = vmatmul.msk.bf16.vlgmr.msra.gmra.mxu3 %vm750_vm2, %v1036_v45 }
 0x2eb   : > { %v1033_v46 = vpop.f32.mrf.mxu2 }
 0x2f3   : > { %v1147_v47 = vpop.f32.mrf.mxu2 }
 0x2f4   : > { %v1152_v48 = vpack.c.bf16 %v1147_v47, %v1147_v47 }
 0x2f6   : > { %1484 = vmatmul.msk.bf16.vlgmr.msrb.gmra.mxu3 %vm750_vm2, %v1152_v48 }
 0x2fb   : > { %v1149_v49 = vpop.f32.mrf.mxu2 }
 0x349   : > { %v822_v51 = vpop.f32.mrf.mxu3 }
 0x34a   : > { %v826_v52 = vadd.f32 %v822_v51, %v804_v50 }
 0x34c   : > { %827 = vst.msk [vmem:[#allocation4] sm:$0xff] %vm423_vm0, %v826_v52 }
 0x351   : > { %v824_v7 = vpop.f32.mrf.mxu3 }
 0x353   : > { %v919_v53 = vld [vmem:[#allocation4] sm:$0xff] }
 0x359   : > { %v938_v54 = vpop.f32.mrf.mxu3 }
 0x35a   : > { %v942_v55 = vadd.f32 %v938_v54, %v919_v53 }
 0x35c   : > { %943 = vst.msk [vmem:[#allocation4] sm:$0xff] %vm423_vm0, %v942_v55 }
 0x361   : > { %v940_v56 = vpop.f32.mrf.mxu3 }
 0x363   : > { %v1035_v57 = vld [vmem:[#allocation4] sm:$0xff] }
 0x369   : > { %v1054_v58 = vpop.f32.mrf.mxu3 }
 0x36a   : > { %v1058_v59 = vadd.f32 %v1054_v58, %v1035_v57 }
 0x36c   : > { %1059 = vst.msk [vmem:[#allocation4] sm:$0xff] %vm423_vm0, %v1058_v59 }
 0x371   : > { %v1056_v60 = vpop.f32.mrf.mxu3 }
 0x373   : > { %v1151_v61 = vld [vmem:[#allocation4] sm:$0xff] }
 0x379   : > { %v1170_v62 = vpop.f32.mrf.mxu3 }
 0x37a   : > { %v1174_v63 = vadd.f32 %v1170_v62, %v1151_v61 }
 0x37c   : > { %1175 = vst.msk [vmem:[#allocation4] sm:$0xff] %vm423_vm0, %v1174_v63 }
 0x381   : > { %v1172_v1 = vpop.f32.mrf.mxu3 }
 0x383   : > { %v1176_v2 = vld [vmem:[#allocation4] sm:$0xff] }
 0x384   : > { %v1181_v3 = vadd.f32 %v1582_v0, %v1176_v2 }
 0x386   : > { %v1182_v4 = vadd.f32 %v1181_v3, %v1825_v6 }
 0x388   : > { %v1185_v5 = vsel %vm423_vm0, %v1182_v4, 0.0 }
 0x389   : > { %1186 = vadd.xlane.f32.xlu2 %v1185_v5 }
 0x3fc   : > { %v1187_v15 = vpop.xlane.xlu2 %1186 }
 0x3fd   : > { %v1195_v16 = vmul.f32 %v1194_v14, %v1187_v15 }
 0x3ff   : > { %v1196_v17 = vsub.f32 %v1182_v4, %v1195_v16 }
 0x401   : > { %v1197_v18 = vmul.f32 %v1196_v17, %v1196_v17 }
 0x403   : > { %v1198_v6 = vsel %vm423_vm0, %v1197_v18, 0.0 }
 0x404   : > { %1199 = vadd.xlane.f32.xlu0 %v1198_v6 }
 0x477   : > { %v1200_v19 = vpop.xlane.xlu0 %1199 }
 0x478   : > { %v1201_v20 = vmul.f32 %v1200_v19, %v1194_v14 }
 0x47a   : > { %v1202_v21 = vadd.f32 1e-06, %v1201_v20 }
 0x47c   : > { %1603 = vrsqrt.f32 %v1202_v21  ;;  %vm1209_vm6 = vweird.f32 %v1202_v21 }
 0x482   : > { %v1604_v22 = vpop.eup %1603 }
 0x483   : > { %v1204_v23 = vmul.f32 %v1604_v22, %v1202_v21  ;;  %vm1210_vm5 = vweird.f32 %v1604_v22 }
 0x484   : > { %vm1211_vm7 = vmor %vm1209_vm6, %vm1210_vm5 }
 0x485   : > { %v1205_v24 = vmul.f32 %v1604_v22, %v1204_v23 }
 0x487   : > { %v1206_v25 = vmul.f32 0.5, %v1205_v24 }
 0x489   : > { %v1207_v26 = vsub.f32 1.5, %v1206_v25 }
 0x48b   : > { %v1208_v27 = vmul.f32 %v1604_v22, %v1207_v26 }
 0x48d   : > { %v1212_v29 = vsel %vm1211_vm7, %v1604_v22, %v1208_v27 }
 0x48e   : > { %v1213_v30 = vmul.f32 %v1212_v29, %v1196_v17 }
 0x490   : > { %v1217_v32 = vmul.f32 %v1583_v28, %v1213_v30 }
 0x492   : > { %v1221_v33 = vadd.f32 %v1584_v31, %v1217_v32 }
 0x494   : > { %1222 = vst.msk [vmem:[%s391_s21] sm:$0xff] %vm423_vm0, %v1221_v33 }
 0x495   : > { %1632 = shalt.err (!%p1629_p5)
}
 0x496   : > { %1513 = dma.vmem_to_hbm [thread:$0]  (%p1787_p4), %s1238_s20, 128, %s1240_s19, %s1224_s30  }
 0x497 PF: > { %p1519_p6 = scmp.ge.s32.totalorder %s1683_s22, 2  ;;  %s1251_s23 = sand.u32 1, %s1663_s17  }
 0x498   : > { %s1252_s25 = scalar_lea.sflag [#allocation6], %s1251_s23 }
 0x499   : > { %p1516_p7 = pnand %p1519_p6, %p1794_p8 }
 0x49b   : > { %p1517_p9 = pneg %p1516_p7 }
 0x49d   : > { %1658 = dma.done.wait (%p1517_p9), %s1252_s25, 128  }
 0x49e   : > { %1660 = vsyncadd (%p1517_p9), %s1252_s25, 4294967168  ;;  %s24_s22 = sadd.s32 1, %s1683_s22   ;;  %s2073_s16 = sld [smem:[#allocation8_spill]] }
 0x49f   : > { %p21_p10 = scmp.ge.s32.totalorder %s24_s22, 4   ;;  %s2074_s19 = sld [smem:[#allocation11_spill]] }
 0x4a0   : > { %s2075_s20 = sld [smem:[#allocation9_spill]]  ;;  %s2077_s17 = smov %s1667_s18 }
 0x4a1   : > { %s2076_s21 = sld [smem:[#allocation10_spill]]  ;;  %23 = sbr.rel (!%p21_p10) target bundleno = 4 (0x4), region = 137 }
 0x4a4   : > { %s2078_s18 = smov %s2073_s16 }
 0x4a6   :  { %1258 = vsyncpa [#allocation6], 1 }
 0x4a7   :  { %1260 = vsyncpa [#allocation6 + $0x1], 1 }

</bundles_post_ra>
